<compile_context>
chip_gen: v5e
topology: v5e:2x2
jax: 0.10.0
libtpu: 0.0.40
codegen_flags: <defaults>
</compile_context>

<pallas_src>
import jax
import jax.numpy as jnp
from jax.experimental import pallas as pl
from jax.experimental.pallas import tpu as pltpu


def _camera_encoder_kernel(x_ref, w1_ref, b1_ref, w2_ref, b2_ref, o_ref):
    # ---- Layer 1 on the MXU: bf16 operands, f32 accumulation ----
    h = jnp.dot(x_ref[...], w1_ref[...],
                preferred_element_type=jnp.float32)          # (TM, 512) f32
    h = jnp.maximum(h + b1_ref[...], 0.0)

    # ---- Layer 2 on the MXU: bf16 operands, f32 accumulation ----
    o = jnp.dot(h.astype(jnp.bfloat16), w2_ref[...],
                preferred_element_type=jnp.float32)          # (TM, 1024) f32
    o = jnp.maximum(o + b2_ref[...], 0.0)

    o_ref[...] = o.astype(o_ref.dtype)


def camera_encoder(camera_data, w1, b1, w2, b2, *,
                   max_tm=1024, out_dtype=jnp.bfloat16):
    """camera_data: (B, 6); returns (B, 1024) in `out_dtype`."""
    B, K = camera_data.shape
    assert K == 6

    # Pad batch to a multiple of 16 (bf16 packs (16,128) per vreg) and pick the
    # tile adaptively: big tiles amortize the ~0.35us/step overhead, >=2 tiles
    # once the batch is large enough so "parallel" shards across v7x's 2 TCs,
    # and tm ~ ceil(B/n_tiles) so the last tile isn't mostly padding.
    b16 = ((B + 15) // 16) * 16
    n_tiles = pl.cdiv(b16, max_tm)
    if n_tiles < 2 and b16 >= 256:
        n_tiles = 2
    tm = ((pl.cdiv(b16, n_tiles) + 15) // 16) * 16
    b_pad = n_tiles * tm

    x = camera_data.astype(jnp.bfloat16)
    if b_pad != B:
        x = jnp.pad(x, ((0, b_pad - B), (0, 0)))

    w1b = w1.astype(jnp.bfloat16)       # tiny; feeds the layer-1 MXU dot
    b1f = b1.astype(jnp.float32)        # biases / bias-add stay f32
    w2b = w2.astype(jnp.bfloat16)       # dominant weight DMA: stream as bf16
    b2f = b2.astype(jnp.float32)

    out_itemsize = jnp.dtype(out_dtype).itemsize
    flops = 2 * b_pad * (6 * 512 + 512 * 1024)
    bytes_accessed = (x.size * 2 + w1b.size * 2 + b1f.size * 4
                      + w2b.size * 2 + b2f.size * 4
                      + b_pad * 1024 * out_itemsize)

    out = pl.pallas_call(
        _camera_encoder_kernel,
        out_shape=jax.ShapeDtypeStruct((b_pad, 1024), out_dtype),
        grid=(n_tiles,),
        in_specs=[
            pl.BlockSpec((tm, 6), lambda i: (i, 0)),        # x tile, pipelined
            pl.BlockSpec((6, 512), lambda i: (0, 0)),       # weights: VMEM-resident
            pl.BlockSpec((1, 512), lambda i: (0, 0)),
            pl.BlockSpec((512, 1024), lambda i: (0, 0)),
            pl.BlockSpec((1, 1024), lambda i: (0, 0)),
        ],
        out_specs=pl.BlockSpec((tm, 1024), lambda i: (i, 0)),
        compiler_params=pltpu.CompilerParams(
            dimension_semantics=("parallel",),
            vmem_limit_bytes=32 * 1024 * 1024),
        cost_estimate=pl.CostEstimate(
            flops=flops, transcendentals=0, bytes_accessed=bytes_accessed),
    )(x, w1b, b1f, w2b, b2f)

    return out[:B]


def init_params(key):
    """Deterministic init mimicking PyTorch nn.Linear default (U[-1/sqrt(fan_in), +])."""
    k1, k2, k3, k4 = jax.random.split(key, 4)
    bound1 = 1.0 / jnp.sqrt(6.0)
    bound2 = 1.0 / jnp.sqrt(512.0)
    # Stored as (in, out) — transposed relative to PyTorch's (out, in).
    w1 = jax.random.uniform(k1, (6, 512), jnp.float32, -bound1, bound1)
    b1 = jax.random.uniform(k2, (1, 512), jnp.float32, -bound1, bound1)
    w2 = jax.random.uniform(k3, (512, 1024), jnp.float32, -bound2, bound2)
    b2 = jax.random.uniform(k4, (1, 1024), jnp.float32, -bound2, bound2)
    return w1, b1, w2, b2


if __name__ == "__main__":
    key = jax.random.PRNGKey(0)
    pkey, xkey = jax.random.split(key)
    w1, b1, w2, b2 = init_params(pkey)

    # Small batch of camera vectors, each of dim 6 (azimuth/elevation/etc.).
    batch = 8
    camera_data = jax.random.normal(xkey, (batch, 6), jnp.float32)

    out = camera_encoder(camera_data, w1, b1, w2, b2)
    out = jax.block_until_ready(out)

    # Reference in plain f32 JAX (same math the PyTorch module performs).
    # Tolerance loosened because the kernel runs both layers with bf16
    # operands (f32 accumulation) and emits a bf16 output.
    ref = jnp.maximum(camera_data @ w1 + b1, 0.0)
    ref = jnp.maximum(ref @ w2 + b2, 0.0)
    assert out.shape == (batch, 1024)
    err = jnp.max(jnp.abs(out.astype(jnp.float32) - ref))
    assert jnp.allclose(out.astype(jnp.float32), ref, atol=5e-2, rtol=5e-2), float(err)

    print("KERNEL_OK")
</pallas_src>

<mosaic_0001>
module attributes {stable_mosaic.version = 11 : i64} {
  func.func @_camera_encoder_kernel(%arg0: i32, %arg1: memref<16x6xbf16, #tpu.memory_space<vmem>>, %arg2: memref<6x512xbf16, #tpu.memory_space<vmem>>, %arg3: memref<1x512xf32, #tpu.memory_space<vmem>>, %arg4: memref<512x1024xbf16, #tpu.memory_space<vmem>>, %arg5: memref<1x1024xf32, #tpu.memory_space<vmem>>, %arg6: memref<16x1024xbf16, #tpu.memory_space<vmem>>) attributes {dimension_semantics = [#tpu.dimension_semantics<parallel>], iteration_bounds = array<i64: 1>, scalar_prefetch = 0 : i64, scratch_operands = 0 : i64, tpu.core_type = #tpu.core_type<tc>, window_params = [{transform_indices = @transform_0, window_bounds = array<i64: 16, 6>}, {pipeline_mode = #tpu.pipeline_mode<synchronous>, transform_indices = @transform_1, window_bounds = array<i64: 6, 512>}, {pipeline_mode = #tpu.pipeline_mode<synchronous>, transform_indices = @transform_2, window_bounds = array<i64: 1, 512>}, {pipeline_mode = #tpu.pipeline_mode<synchronous>, transform_indices = @transform_3, window_bounds = array<i64: 512, 1024>}, {pipeline_mode = #tpu.pipeline_mode<synchronous>, transform_indices = @transform_4, window_bounds = array<i64: 1, 1024>}, {transform_indices = @transform_5, window_bounds = array<i64: 16, 1024>}]} {
    %c0 = arith.constant 0 : index
    %c0_0 = arith.constant 0 : index
    %0 = vector.load %arg1[%c0, %c0_0] : memref<16x6xbf16, #tpu.memory_space<vmem>>, vector<16x6xbf16>
    %c0_1 = arith.constant 0 : index
    %c0_2 = arith.constant 0 : index
    %1 = vector.load %arg2[%c0_1, %c0_2] : memref<6x512xbf16, #tpu.memory_space<vmem>>, vector<6x512xbf16>
    %cst = arith.constant dense<0.000000e+00> : vector<16x512xf32>
    %2 = tpu.matmul %0, %1, %cst {dimension_numbers = #tpu.dot_dimension_numbers<[1], [0], [0], [1], [0, 0, 1, 1], [], []>} : vector<16x6xbf16>, vector<6x512xbf16>, vector<16x512xf32> -> vector<16x512xf32>
    %c0_3 = arith.constant 0 : index
    %c0_4 = arith.constant 0 : index
    %3 = vector.load %arg3[%c0_3, %c0_4] : memref<1x512xf32, #tpu.memory_space<vmem>>, vector<1x512xf32>
    %4 = vector.broadcast %3 : vector<1x512xf32> to vector<16x512xf32>
    %5 = arith.addf %2, %4 : vector<16x512xf32>
    %cst_5 = arith.constant 0.000000e+00 : f32
    %6 = vector.broadcast %cst_5 : f32 to vector<16x512xf32>
    %7 = arith.maximumf %5, %6 : vector<16x512xf32>
    %8 = arith.truncf %7 : vector<16x512xf32> to vector<16x512xbf16>
    %c0_6 = arith.constant 0 : index
    %c0_7 = arith.constant 0 : index
    %9 = vector.load %arg4[%c0_6, %c0_7] : memref<512x1024xbf16, #tpu.memory_space<vmem>>, vector<512x1024xbf16>
    %cst_8 = arith.constant dense<0.000000e+00> : vector<16x1024xf32>
    %10 = tpu.matmul %8, %9, %cst_8 {dimension_numbers = #tpu.dot_dimension_numbers<[1], [0], [0], [1], [0, 0, 1, 1], [], []>} : vector<16x512xbf16>, vector<512x1024xbf16>, vector<16x1024xf32> -> vector<16x1024xf32>
    %c0_9 = arith.constant 0 : index
    %c0_10 = arith.constant 0 : index
    %11 = vector.load %arg5[%c0_9, %c0_10] : memref<1x1024xf32, #tpu.memory_space<vmem>>, vector<1x1024xf32>
    %12 = vector.broadcast %11 : vector<1x1024xf32> to vector<16x1024xf32>
    %13 = arith.addf %10, %12 : vector<16x1024xf32>
    %cst_11 = arith.constant 0.000000e+00 : f32
    %14 = vector.broadcast %cst_11 : f32 to vector<16x1024xf32>
    %15 = arith.maximumf %13, %14 : vector<16x1024xf32>
    %16 = arith.truncf %15 : vector<16x1024xf32> to vector<16x1024xbf16>
    %c0_12 = arith.constant 0 : index
    %c0_13 = arith.constant 0 : index
    %17 = vector.load %arg6[%c0_12, %c0_13] : memref<16x1024xbf16, #tpu.memory_space<vmem>>, vector<16x1024xbf16>
    tpu.vector_store %arg6[%c0_12, %c0_13], %16 {strides = array<i32>} : memref<16x1024xbf16, #tpu.memory_space<vmem>>, vector<16x1024xbf16>,
    return
  }
  func.func @transform_0(%arg0: i32) -> (i32, i32) {
    %c0_i32 = arith.constant 0 : i32
    %c0_i32_0 = arith.constant 0 : i32
    return %arg0, %c0_i32 : i32, i32
  }
  func.func @transform_1(%arg0: i32) -> (i32, i32) {
    %c0_i32 = arith.constant 0 : i32
    %c0_i32_0 = arith.constant 0 : i32
    %c0_i32_1 = arith.constant 0 : i32
    return %c0_i32, %c0_i32_0 : i32, i32
  }
  func.func @transform_2(%arg0: i32) -> (i32, i32) {
    %c0_i32 = arith.constant 0 : i32
    %c0_i32_0 = arith.constant 0 : i32
    %c0_i32_1 = arith.constant 0 : i32
    return %c0_i32, %c0_i32_0 : i32, i32
  }
  func.func @transform_3(%arg0: i32) -> (i32, i32) {
    %c0_i32 = arith.constant 0 : i32
    %c0_i32_0 = arith.constant 0 : i32
    %c0_i32_1 = arith.constant 0 : i32
    return %c0_i32, %c0_i32_0 : i32, i32
  }
  func.func @transform_4(%arg0: i32) -> (i32, i32) {
    %c0_i32 = arith.constant 0 : i32
    %c0_i32_0 = arith.constant 0 : i32
    %c0_i32_1 = arith.constant 0 : i32
    return %c0_i32, %c0_i32_0 : i32, i32
  }
  func.func @transform_5(%arg0: i32) -> (i32, i32) {
    %c0_i32 = arith.constant 0 : i32
    %c0_i32_0 = arith.constant 0 : i32
    return %arg0, %c0_i32 : i32, i32
  }
}

</mosaic_0001>

<bundles_post_ra>
// kernel: tpu_custom_call.1
= control target key start
LH: loop header
LB: loop body
LE: loop exit
PB: predicated region body
PF: predicated region fallthrough
CT: control target
= control target key end

     0   :  { %10 = vsyncpa [#allocation3], 0  ;;  %s3741_s0 = inlined_call_operand.vmem [shape: bf16[16,6], index: 0, kind: input, shape index: {}]   ;;  %s3742_s1 = inlined_call_operand.hbm [shape: bf16[6,512], index: 1, kind: input, shape index: {}]   ;;  %s3743_s2 = inlined_call_operand.vmem [shape: f32[1,512], index: 2, kind: input, shape index: {}]   ;;  %s3744_s3 = inlined_call_operand.hbm [shape: bf16[512,1024], index: 3, kind: input, shape index: {}]   ;;  %s3745_s4 = inlined_call_operand.vmem [shape: f32[1,1024], index: 4, kind: input, shape index: {}]   ;;  %s3746_s5 = inlined_call_operand.hbm [shape: bf16[16,1024], index: 5, kind: output, shape index: {}]  }
   0x1   :  { %11 = vsyncpa [#allocation6], 0 }
   0x2   :  { %12 = vsyncpa [#allocation4], 0  ;;  %s20_s20 = sshll.u32 %s3742_s1, 4  ;;  %s3592_s21 = smov [#allocation2]   ;;  %s21_s20 = int_to_ptr.hbm [resolvable:$true] %s20_s20 }
   0x3   :  { %s22_s22 = sshll.u32 %s3592_s21, 4  ;;  %s32_s25 = sshll.u32 %s3744_s3, 4  ;;  %s23_s22 = int_to_ptr.vmem [resolvable:$true] %s22_s22  ;;  %s33_s25 = int_to_ptr.hbm [resolvable:$true] %s32_s25 }
   0x4   :  { %25 = dma.hbm_to_vmem [thread:$0]  %s21_s20, 256, %s23_s22, [#allocation3]  }
   0x5   :  { %s3593_s26 = smov [#allocation5]   ;;  %s3594_s28 = smov 512  }
   0x6   :  { %s34_s27 = sshll.u32 %s3593_s26, 4  ;;  %s3595_s29 = smov 32   ;;  %s35_s27 = int_to_ptr.vmem [resolvable:$true] %s34_s27 }
   0x7   :  { %40 = dma.hbm_to_vmem [thread:$0]  %s33_s25, 32768, %s35_s27, [#allocation6], %s3594_s28, %s3594_s28, %s3595_s29  }
   0x8   :  { %3586 = dma.done.wait [#allocation3], 256  }
   0x9   :  { %3587 = vsyncadd [#allocation3], 4294967040 }
   0xa   :  { %3588 = dma.done.wait [#allocation6], 32768  }
   0xb   :  { %3589 = vsyncadd [#allocation6], 4294934528  ;;  %v54_v0 = vld [vmem:[#allocation2] sm:$0x77]  ;;  %v55_v1 = vld [vmem:[#allocation2 + $0x8] sm:$0x77] }
   0xc   :  { %v73_v2 = vunpack.c.l.b16 %v54_v0  ;;  %v74_v3 = vunpack.c.h.b16 %v54_v0  ;;  %v75_v4 = vunpack.c.l.b16 %v55_v1  ;;  %v76_v5 = vunpack.c.h.b16 %v55_v1  ;;  %v2454_v6 = vld [vmem:[#allocation5 + $0x1c0] sm:$0xf]  ;;  %v3252_v14 = vld [vmem:[%s3741_s0] sm:$0xff]  ;;  %s2206_s10 = sshll.u32 %s3746_s5, 4  ;;  %s2207_s10 = int_to_ptr.hbm [resolvable:$true] %s2206_s10 }
   0xd   :  { %v3313_v7 = vld [vmem:[#allocation5 + $0x1dc] sm:$0xf0]  ;;  %vm85_vm0 = vcmask 1042432   ;;  %vm81_vm1 = vcmask 48128  }
   0xe   :  { %v2710_v8 = vld [vmem:[#allocation5 + $0x3c0] sm:$0xf]  ;;  %v77_v10 = vpack.c.b16 %v73_v2, %v73_v2  ;;  %v78_v11 = vpack.c.b16 %v74_v3, %v74_v3  ;;  %v79_v12 = vpack.c.b16 %v75_v4, %v75_v4  ;;  %v80_v13 = vpack.c.b16 %v76_v5, %v76_v5 }
   0xf   :  { %v3377_v9 = vld [vmem:[#allocation5 + $0x3dc] sm:$0xf0]  ;;  %v2455_v19 = vor.u32 %v3313_v7, %v2454_v6 }
  0x10   :  { %v2422_v15 = vld [vmem:[#allocation5 + $0x180] sm:$0xf]  ;;  %v2711_v20 = vor.u32 %v3377_v9, %v2710_v8  ;;  %v87_v24 = vsel %vm85_vm0, %v77_v10, 0  ;;  %v90_v25 = vsel %vm85_vm0, %v78_v11, 0  ;;  %v93_v26 = vsel %vm85_vm0, %v79_v12, 0 }
  0x11   :  { %v3305_v16 = vld [vmem:[#allocation5 + $0x19c] sm:$0xf0]  ;;  %v96_v27 = vsel %vm85_vm0, %v80_v13, 0  ;;  %105 = vmatpush.bf16.msra.mxu0 %v87_v24  ;;  %119 = vmatpush.bf16.msra.mxu1 %v90_v25 }
  0x12   :  { %v2678_v17 = vld [vmem:[#allocation5 + $0x380] sm:$0xf]  ;;  %133 = vmatpush.bf16.msra.mxu2 %v93_v26  ;;  %147 = vmatpush.bf16.msra.mxu3 %v96_v27  ;;  %v2423_v33 = vor.u32 %v3305_v16, %v2422_v15 }
  0x13   :  { %v2966_v18 = vld [vmem:[#allocation5 + $0x5c0] sm:$0xf] }
  0x14   :  { %v3441_v21 = vld [vmem:[#allocation5 + $0x5dc] sm:$0xf0]  ;;  %2224 = vmatmul.msk.bf16.vlgmr.msra.gmra.mxu0 %vm81_vm1, %v3252_v14  ;;  %2225 = vmatmul.msk.bf16.vlgmr.msra.gmra.mxu1 %vm81_vm1, %v3252_v14 }
  0x15   :  { %v3222_v22 = vld [vmem:[#allocation5 + $0x7c0] sm:$0xf]  ;;  %v2967_v29 = vor.u32 %v3441_v21, %v2966_v18  ;;  %1720 = vmatpush.bf16.msrb.mxu0 %v2455_v19  ;;  %1734 = vmatpush.bf16.msrb.mxu1 %v2711_v20 }
  0x16   :  { %v3505_v23 = vld [vmem:[#allocation5 + $0x7dc] sm:$0xf0]  ;;  %2226 = vmatmul.msk.bf16.vlgmr.msra.gmra.mxu2 %vm81_vm1, %v3252_v14  ;;  %2227 = vmatmul.msk.bf16.vlgmr.msra.gmra.mxu3 %vm81_vm1, %v3252_v14 }
  0x17   :  { %v3369_v28 = vld [vmem:[#allocation5 + $0x39c] sm:$0xf0]  ;;  %v3223_v30 = vor.u32 %v3505_v23, %v3222_v22  ;;  %1748 = vmatpush.bf16.msrb.mxu2 %v2967_v29 }
  0x18   :  { %v2390_v31 = vld [vmem:[#allocation5 + $0x140] sm:$0xf]  ;;  %v2679_v34 = vor.u32 %v3369_v28, %v2678_v17 }
  0x19   :  { %v2934_v32 = vld [vmem:[#allocation5 + $0x580] sm:$0xf]  ;;  %1762 = vmatpush.bf16.msrb.mxu3 %v3223_v30  ;;  %1721 = vmatpush.bf16.msrb.mxu0 %v2423_v33 }
  0x1a   :  { %v3433_v35 = vld [vmem:[#allocation5 + $0x59c] sm:$0xf0]  ;;  %1735 = vmatpush.bf16.msrb.mxu1 %v2679_v34 }
  0x1b   :  { %v3190_v36 = vld [vmem:[#allocation5 + $0x780] sm:$0xf]  ;;  %v2935_v41 = vor.u32 %v3433_v35, %v2934_v32 }
  0x1c   :  { %v3497_v37 = vld [vmem:[#allocation5 + $0x79c] sm:$0xf0] }
  0x1d   :  { %v3297_v38 = vld [vmem:[#allocation5 + $0x15c] sm:$0xf0]  ;;  %v3191_v42 = vor.u32 %v3497_v37, %v3190_v36  ;;  %1749 = vmatpush.bf16.msrb.mxu2 %v2935_v41  ;;  %v3309_v37 = vld [vmem:[#allocation5 + $0x1c4] sm:$0xf] }
  0x1e   :  { %v2646_v39 = vld [vmem:[#allocation5 + $0x340] sm:$0xf]  ;;  %v2391_v45 = vor.u32 %v3297_v38, %v2390_v31  ;;  %v2456_v38 = vld [vmem:[#allocation5 + $0x1e0] sm:$0xf0] }
  0x1f   :  { %v3361_v40 = vld [vmem:[#allocation5 + $0x35c] sm:$0xf0]  ;;  %1763 = vmatpush.bf16.msrb.mxu3 %v3191_v42 }
  0x20   :  { %v2358_v43 = vld [vmem:[#allocation5 + $0x100] sm:$0xf]  ;;  %v2647_v46 = vor.u32 %v3361_v40, %v2646_v39  ;;  %1722 = vmatpush.bf16.msrb.mxu0 %v2391_v45  ;;  %v3373_v39 = vld [vmem:[#allocation5 + $0x3c4] sm:$0xf] }
  0x21   :  { %v2902_v44 = vld [vmem:[#allocation5 + $0x540] sm:$0xf]  ;;  %v2712_v40 = vld [vmem:[#allocation5 + $0x3e0] sm:$0xf0] }
  0x22   :  { %v3425_v47 = vld [vmem:[#allocation5 + $0x55c] sm:$0xf0]  ;;  %1736 = vmatpush.bf16.msrb.mxu1 %v2647_v46 }
  0x23   :  { %v3158_v48 = vld [vmem:[#allocation5 + $0x740] sm:$0xf]  ;;  %v2903_v53 = vor.u32 %v3425_v47, %v2902_v44  ;;  %v3301_v47 = vld [vmem:[#allocation5 + $0x184] sm:$0xf] }
  0x24   :  { %v3489_v49 = vld [vmem:[#allocation5 + $0x75c] sm:$0xf0] }
  0x25   :  { %v3289_v50 = vld [vmem:[#allocation5 + $0x11c] sm:$0xf0]  ;;  %v3159_v54 = vor.u32 %v3489_v49, %v3158_v48  ;;  %1750 = vmatpush.bf16.msrb.mxu2 %v2903_v53  ;;  %v2968_v53 = vld [vmem:[#allocation5 + $0x5e0] sm:$0xf0] }
  0x26   :  { %v2614_v51 = vld [vmem:[#allocation5 + $0x300] sm:$0xf]  ;;  %v2359_v57 = vor.u32 %v3289_v50, %v2358_v43  ;;  %v3437_v50 = vld [vmem:[#allocation5 + $0x5c4] sm:$0xf] }
  0x27   :  { %v3353_v52 = vld [vmem:[#allocation5 + $0x31c] sm:$0xf0]  ;;  %1764 = vmatpush.bf16.msrb.mxu3 %v3159_v54  ;;  %v3501_v54 = vld [vmem:[#allocation5 + $0x7c4] sm:$0xf] }
  0x28   :  { %v2326_v55 = vld [vmem:[#allocation5 + $0xc0] sm:$0xf]  ;;  %v2615_v58 = vor.u32 %v3353_v52, %v2614_v51  ;;  %1723 = vmatpush.bf16.msrb.mxu0 %v2359_v57  ;;  %v2459_v51 = vor.u32 %v3309_v37, %v2456_v38  ;;  %v2715_v52 = vor.u32 %v3373_v39, %v2712_v40  ;;  %v3365_v57 = vld [vmem:[#allocation5 + $0x384] sm:$0xf] }
  0x29   :  { %v2870_v56 = vld [vmem:[#allocation5 + $0x500] sm:$0xf]  ;;  %v3269_v37 = vld [vmem:[#allocation5 + $0x84] sm:$0xf] }
  0x2a   :  { %v3417_v59 = vld [vmem:[#allocation5 + $0x51c] sm:$0xf0]  ;;  %1737 = vmatpush.bf16.msrb.mxu1 %v2615_v58  ;;  %v2680_v58 = vld [vmem:[#allocation5 + $0x3a0] sm:$0xf0] }
  0x2b   :  { %v3126_v60 = vld [vmem:[#allocation5 + $0x700] sm:$0xf]  ;;  %v2871_v1 = vor.u32 %v3417_v59, %v2870_v56  ;;  %v2424_v56 = vld [vmem:[#allocation5 + $0x1a0] sm:$0xf0] }
  0x2c   :  { %v3481_v61 = vld [vmem:[#allocation5 + $0x71c] sm:$0xf0]  ;;  %v2296_v38 = vld [vmem:[#allocation5 + $0xa0] sm:$0xf0] }
  0x2d   :  { %v3281_v62 = vld [vmem:[#allocation5 + $0xdc] sm:$0xf0]  ;;  %v3127_v2 = vor.u32 %v3481_v61, %v3126_v60  ;;  %1751 = vmatpush.bf16.msrb.mxu2 %v2871_v1  ;;  %v2971_v61 = vor.u32 %v3437_v50, %v2968_v53  ;;  %v2427_v1 = vor.u32 %v3301_v47, %v2424_v56  ;;  %v3333_v39 = vld [vmem:[#allocation5 + $0x284] sm:$0xf]  ;;  %v2299_v40 = vor.u32 %v3269_v37, %v2296_v38 }
  0x2e   :  { %v2582_v63 = vld [vmem:[#allocation5 + $0x2c0] sm:$0xf]  ;;  %v2327_v5 = vor.u32 %v3281_v62, %v2326_v55  ;;  %v3224_v55 = vld [vmem:[#allocation5 + $0x7e0] sm:$0xf0] }
  0x2f   :  { %v3345_v0 = vld [vmem:[#allocation5 + $0x2dc] sm:$0xf0]  ;;  %1765 = vmatpush.bf16.msrb.mxu3 %v3127_v2  ;;  %v3227_v62 = vor.u32 %v3501_v54, %v3224_v55  ;;  %v2683_v2 = vor.u32 %v3365_v57, %v2680_v58  ;;  %v3096_v47 = vld [vmem:[#allocation5 + $0x6e0] sm:$0xf0] }
  0x30   :  { %v2294_v3 = vld [vmem:[#allocation5 + $0x80] sm:$0xf]  ;;  %v2583_v6 = vor.u32 %v3345_v0, %v2582_v63  ;;  %1724 = vmatpush.bf16.msrb.mxu0 %v2327_v5  ;;  %v3293_v63 = vld [vmem:[#allocation5 + $0x144] sm:$0xf] }
  0x31   :  { %v2838_v4 = vld [vmem:[#allocation5 + $0x4c0] sm:$0xf]  ;;  %v3429_v0 = vld [vmem:[#allocation5 + $0x584] sm:$0xf] }
  0x32   :  { %v3409_v7 = vld [vmem:[#allocation5 + $0x4dc] sm:$0xf0]  ;;  %1738 = vmatpush.bf16.msrb.mxu1 %v2583_v6  ;;  %v3192_v5 = vld [vmem:[#allocation5 + $0x7a0] sm:$0xf0] }
  0x33   :  { %v3094_v8 = vld [vmem:[#allocation5 + $0x6c0] sm:$0xf]  ;;  %v2839_v13 = vor.u32 %v3409_v7, %v2838_v4  ;;  %v3493_v4 = vld [vmem:[#allocation5 + $0x784] sm:$0xf] }
  0x34   :  { %v3473_v9 = vld [vmem:[#allocation5 + $0x6dc] sm:$0xf0]  ;;  %v2392_v6 = vld [vmem:[#allocation5 + $0x160] sm:$0xf0] }
  0x35   :  { %v3273_v10 = vld [vmem:[#allocation5 + $0x9c] sm:$0xf0]  ;;  %v3095_v14 = vor.u32 %v3473_v9, %v3094_v8  ;;  %1752 = vmatpush.bf16.msrb.mxu2 %v2839_v13  ;;  %v3357_v7 = vld [vmem:[#allocation5 + $0x344] sm:$0xf] }
  0x36   :  { %v2550_v11 = vld [vmem:[#allocation5 + $0x280] sm:$0xf]  ;;  %v2295_v17 = vor.u32 %v3273_v10, %v2294_v3  ;;  %v2936_v3 = vld [vmem:[#allocation5 + $0x5a0] sm:$0xf0]  ;;  %v3195_v10 = vor.u32 %v3493_v4, %v3192_v5 }
  0x37   :  { %v3337_v12 = vld [vmem:[#allocation5 + $0x29c] sm:$0xf0]  ;;  %1766 = vmatpush.bf16.msrb.mxu3 %v3095_v14  ;;  %v2648_v8 = vld [vmem:[#allocation5 + $0x360] sm:$0xf0]  ;;  %v2939_v9 = vor.u32 %v3429_v0, %v2936_v3 }
  0x38   :  { %v2262_v15 = vld [vmem:[#allocation5 + $0x40] sm:$0xf]  ;;  %v2551_v18 = vor.u32 %v3337_v12, %v2550_v11  ;;  %1725 = vmatpush.bf16.msrb.mxu0 %v2295_v17  ;;  %v2395_v11 = vor.u32 %v3293_v63, %v2392_v6  ;;  %v2651_v12 = vor.u32 %v3357_v7, %v2648_v8  ;;  %v3285_v13 = vld [vmem:[#allocation5 + $0x104] sm:$0xf] }
  0x39   :  { %v2806_v16 = vld [vmem:[#allocation5 + $0x480] sm:$0xf]  ;;  %v2360_v14 = vld [vmem:[#allocation5 + $0x120] sm:$0xf0] }
  0x3a   :  { %v3401_v19 = vld [vmem:[#allocation5 + $0x49c] sm:$0xf0]  ;;  %1739 = vmatpush.bf16.msrb.mxu1 %v2551_v18  ;;  %v2363_v17 = vor.u32 %v3285_v13, %v2360_v14  ;;  %v2264_v50 = vld [vmem:[#allocation5 + $0x60] sm:$0xf0] }
  0x3b   :  { %v3062_v20 = vld [vmem:[#allocation5 + $0x680] sm:$0xf]  ;;  %v2807_v25 = vor.u32 %v3401_v19, %v2806_v16  ;;  %v2616_v16 = vld [vmem:[#allocation5 + $0x320] sm:$0xf0] }
  0x3c   :  { %v3465_v21 = vld [vmem:[#allocation5 + $0x69c] sm:$0xf0]  ;;  %v3421_v19 = vld [vmem:[#allocation5 + $0x544] sm:$0xf] }
  0x3d   :  { %v3265_v22 = vld [vmem:[#allocation5 + $0x5c] sm:$0xf0]  ;;  %v3063_v26 = vor.u32 %v3465_v21, %v3062_v20  ;;  %1753 = vmatpush.bf16.msrb.mxu2 %v2807_v25  ;;  %v2904_v20 = vld [vmem:[#allocation5 + $0x560] sm:$0xf0] }
  0x3e   :  { %v2518_v23 = vld [vmem:[#allocation5 + $0x240] sm:$0xf]  ;;  %v2263_v30 = vor.u32 %v3265_v22, %v2262_v15  ;;  %v3349_v15 = vld [vmem:[#allocation5 + $0x304] sm:$0xf]  ;;  %v2907_v22 = vor.u32 %v3421_v19, %v2904_v20 }
  0x3f   :  { %v3329_v24 = vld [vmem:[#allocation5 + $0x25c] sm:$0xf0]  ;;  %1767 = vmatpush.bf16.msrb.mxu3 %v3063_v26  ;;  %v2619_v18 = vor.u32 %v3349_v15, %v2616_v16  ;;  %v3485_v21 = vld [vmem:[#allocation5 + $0x744] sm:$0xf]  ;;  %v56_v15 = vld [vmem:[%s3743_s2] sm:$0xf] }
  0x40   :  { %v2230_v27 = vld [vmem:[#allocation5] sm:$0xf]  ;;  %v2519_v31 = vor.u32 %v3329_v24, %v2518_v23  ;;  %1726 = vmatpush.bf16.msrb.mxu0 %v2263_v30  ;;  %v3160_v23 = vld [vmem:[#allocation5 + $0x760] sm:$0xf0]  ;;  %v59_v19 = vperm.slane %v56_v15, 1 }
  0x41   :  { %v3257_v28 = vld [vmem:[#allocation5 + $0x1c] sm:$0xf0]  ;;  %v3163_v24 = vor.u32 %v3485_v21, %v3160_v23  ;;  %v3277_v25 = vld [vmem:[#allocation5 + $0xc4] sm:$0xf] }
  0x42   :  { %v2774_v29 = vld [vmem:[#allocation5 + $0x440] sm:$0xf]  ;;  %1740 = vmatpush.bf16.msrb.mxu1 %v2519_v31  ;;  %v2231_v45 = vor.u32 %v3257_v28, %v2230_v27  ;;  %v2328_v26 = vld [vmem:[#allocation5 + $0xe0] sm:$0xf0] }
  0x43   :  { %v3393_v32 = vld [vmem:[#allocation5 + $0x45c] sm:$0xf0]  ;;  %v3341_v27 = vld [vmem:[#allocation5 + $0x2c4] sm:$0xf]  ;;  %v2331_v28 = vor.u32 %v3277_v25, %v2328_v26  ;;  %v2462_v26 = vld [vmem:[#allocation5 + $0x1c8] sm:$0xf] }
  0x44   :  { %v3030_v33 = vld [vmem:[#allocation5 + $0x640] sm:$0xf]  ;;  %v2775_v41 = vor.u32 %v3393_v32, %v2774_v29  ;;  %1727 = vmatpush.bf16.msrb.mxu0 %v2231_v45  ;;  %v2584_v29 = vld [vmem:[#allocation5 + $0x2e0] sm:$0xf0] }
  0x45   :  { %v3457_v34 = vld [vmem:[#allocation5 + $0x65c] sm:$0xf0]  ;;  %v2587_v30 = vor.u32 %v3341_v27, %v2584_v29  ;;  %v3413_v31 = vld [vmem:[#allocation5 + $0x504] sm:$0xf]  ;;  %v3314_v27 = vld [vmem:[#allocation5 + $0x1e4] sm:$0xf0] }
  0x46   :  { %v2486_v35 = vld [vmem:[#allocation5 + $0x200] sm:$0xf]  ;;  %v3031_v42 = vor.u32 %v3457_v34, %v3030_v33  ;;  %1754 = vmatpush.bf16.msrb.mxu2 %v2775_v41  ;;  %v2872_v32 = vld [vmem:[#allocation5 + $0x520] sm:$0xf0]  ;;  %v2463_v38 = vor.u32 %v3314_v27, %v2462_v26  ;;  %v2590_v26 = vld [vmem:[#allocation5 + $0x2c8] sm:$0xf] }
  0x47   :  { %v3321_v36 = vld [vmem:[#allocation5 + $0x21c] sm:$0xf0]  ;;  %v3477_v33 = vld [vmem:[#allocation5 + $0x704] sm:$0xf]  ;;  %v2875_v34 = vor.u32 %v3413_v31, %v2872_v32  ;;  %v2718_v32 = vld [vmem:[#allocation5 + $0x3c8] sm:$0xf] }
  0x48   :  { %v2742_v43 = vld [vmem:[#allocation5 + $0x400] sm:$0xf]  ;;  %v2487_v46 = vor.u32 %v3321_v36, %v2486_v35  ;;  %1768 = vmatpush.bf16.msrb.mxu3 %v3031_v42  ;;  %1776 = vmatpush.bf16.msra.mxu0 %v2459_v51  ;;  %v3128_v35 = vld [vmem:[#allocation5 + $0x720] sm:$0xf0]  ;;  %v3346_v27 = vld [vmem:[#allocation5 + $0x2e4] sm:$0xf0] }
  0x49   :  { %v3385_v44 = vld [vmem:[#allocation5 + $0x41c] sm:$0xf0]  ;;  %v3131_v36 = vor.u32 %v3477_v33, %v3128_v35  ;;  %v2552_v41 = vld [vmem:[#allocation5 + $0x2a0] sm:$0xf0]  ;;  %v3378_v33 = vld [vmem:[#allocation5 + $0x3e4] sm:$0xf0] }
  0x4a   :  { %v2998_v48 = vld [vmem:[#allocation5 + $0x600] sm:$0xf]  ;;  %v2743_v59 = vor.u32 %v3385_v44, %v2742_v43  ;;  %1741 = vmatpush.bf16.msrb.mxu1 %v2487_v46  ;;  %v2555_v42 = vor.u32 %v3333_v39, %v2552_v41  ;;  %v3405_v43 = vld [vmem:[#allocation5 + $0x4c4] sm:$0xf]  ;;  %v61_v35 = vperm.slane %v56_v15, 3  ;;  %v2719_v39 = vor.u32 %v3378_v33, %v2718_v32 }
  0x4b   :  { %v3449_v49 = vld [vmem:[#allocation5 + $0x61c] sm:$0xf0]  ;;  %v2840_v44 = vld [vmem:[#allocation5 + $0x4e0] sm:$0xf0]  ;;  %v3306_v41 = vld [vmem:[#allocation5 + $0x1a4] sm:$0xf0] }
  0x4c   :  { %v2999_v60 = vor.u32 %v3449_v49, %v2998_v48  ;;  %1755 = vmatpush.bf16.msrb.mxu2 %v2743_v59  ;;  %1777 = vmatpush.bf16.msra.mxu0 %v2427_v1  ;;  %v3469_v45 = vld [vmem:[#allocation5 + $0x6c4] sm:$0xf]  ;;  %v2843_v46 = vor.u32 %v3405_v43, %v2840_v44  ;;  %v2686_v44 = vld [vmem:[#allocation5 + $0x388] sm:$0xf] }
  0x4d   :  { %v3099_v48 = vor.u32 %v3469_v45, %v3096_v47  ;;  %v3261_v49 = vld [vmem:[#allocation5 + $0x44] sm:$0xf]  ;;  %v3370_v45 = vld [vmem:[#allocation5 + $0x3a4] sm:$0xf0] }
  0x4e   :  { %1790 = vmatpush.bf16.msra.mxu1 %v2715_v52  ;;  %1769 = vmatpush.bf16.msrb.mxu3 %v2999_v60  ;;  %v2267_v51 = vor.u32 %v3261_v49, %v2264_v50  ;;  %v3325_v52 = vld [vmem:[#allocation5 + $0x244] sm:$0xf]  ;;  %v3134_v32 = vld [vmem:[#allocation5 + $0x708] sm:$0xf] }
  0x4f   :  { %v2520_v53 = vld [vmem:[#allocation5 + $0x260] sm:$0xf0]  ;;  %v3482_v33 = vld [vmem:[#allocation5 + $0x724] sm:$0xf0] }
  0x50   :  { %1804 = vmatpush.bf16.msra.mxu2 %v2971_v61  ;;  %1778 = vmatpush.bf16.msra.mxu0 %v2395_v11  ;;  %v2523_v54 = vor.u32 %v3325_v52, %v2520_v53  ;;  %v3397_v55 = vld [vmem:[#allocation5 + $0x484] sm:$0xf]  ;;  %v3442_v52 = vld [vmem:[#allocation5 + $0x5e4] sm:$0xf0] }
  0x51   :  { %v2808_v56 = vld [vmem:[#allocation5 + $0x4a0] sm:$0xf0]  ;;  %v3230_v53 = vld [vmem:[#allocation5 + $0x7c8] sm:$0xf] }
  0x52   :  { %1818 = vmatpush.bf16.msra.mxu3 %v3227_v62  ;;  %1791 = vmatpush.bf16.msra.mxu1 %v2683_v2  ;;  %v3461_v57 = vld [vmem:[#allocation5 + $0x684] sm:$0xf]  ;;  %v2811_v58 = vor.u32 %v3397_v55, %v2808_v56  ;;  %v2687_v56 = vor.u32 %v3370_v45, %v2686_v44  ;;  %v2846_v44 = vld [vmem:[#allocation5 + $0x4c8] sm:$0xf] }
  0x53   :  { %v3064_v59 = vld [vmem:[#allocation5 + $0x6a0] sm:$0xf0]  ;;  %v3410_v45 = vld [vmem:[#allocation5 + $0x4e4] sm:$0xf0] }
  0x54   :  { %1805 = vmatpush.bf16.msra.mxu2 %v2939_v9  ;;  %1779 = vmatpush.bf16.msra.mxu0 %v2363_v17  ;;  %v3067_v60 = vor.u32 %v3461_v57, %v3064_v59  ;;  %v3253_v61 = vld [vmem:[#allocation5 + $0x4] sm:$0xf]  ;;  %v3506_v57 = vld [vmem:[#allocation5 + $0x7e4] sm:$0xf0] }
  0x55   :  { %v2232_v62 = vld [vmem:[#allocation5 + $0x20] sm:$0xf0]  ;;  %v3298_v59 = vld [vmem:[#allocation5 + $0x164] sm:$0xf0] }
  0x56   :  { %1819 = vmatpush.bf16.msra.mxu3 %v3195_v10  ;;  %1792 = vmatpush.bf16.msra.mxu1 %v2651_v12  ;;  %v3317_v63 = vld [vmem:[#allocation5 + $0x204] sm:$0xf]  ;;  %v2235_v0 = vor.u32 %v3253_v61, %v2232_v62  ;;  %v3362_v61 = vld [vmem:[#allocation5 + $0x364] sm:$0xf0] }
  0x57   :  { %v2488_v1 = vld [vmem:[#allocation5 + $0x220] sm:$0xf0] }
  0x58   :  { %1806 = vmatpush.bf16.msra.mxu2 %v2907_v22  ;;  %1780 = vmatpush.bf16.msra.mxu0 %v2331_v28  ;;  %v2491_v2 = vor.u32 %v3317_v63, %v2488_v1  ;;  %v3389_v3 = vld [vmem:[#allocation5 + $0x444] sm:$0xf] }
  0x59   :  { %v2776_v4 = vld [vmem:[#allocation5 + $0x460] sm:$0xf0] }
  0x5a   :  { %1793 = vmatpush.bf16.msra.mxu1 %v2619_v18  ;;  %1820 = vmatpush.bf16.msra.mxu3 %v3163_v24  ;;  %v3453_v5 = vld [vmem:[#allocation5 + $0x644] sm:$0xf]  ;;  %v2779_v7 = vor.u32 %v3389_v3, %v2776_v4  ;;  %v58_v18 = vperm.slane %v56_v15, 0  ;;  %v3231_v3 = vor.u32 %v3506_v57, %v3230_v53  ;;  %v3330_v53 = vld [vmem:[#allocation5 + $0x264] sm:$0xf0] }
  0x5b   :  { %v3032_v6 = vld [vmem:[#allocation5 + $0x660] sm:$0xf0]  ;;  %v3402_v57 = vld [vmem:[#allocation5 + $0x4a4] sm:$0xf0] }
  0x5c   :  { %1807 = vmatpush.bf16.msra.mxu2 %v2875_v34  ;;  %1781 = vmatpush.bf16.msra.mxu0 %v2299_v40  ;;  %v3035_v8 = vor.u32 %v3453_v5, %v3032_v6  ;;  %v3381_v9 = vld [vmem:[#allocation5 + $0x404] sm:$0xf]  ;;  %v60_v34 = vperm.slane %v56_v15, 2  ;;  %v2430_v40 = vld [vmem:[#allocation5 + $0x188] sm:$0xf] }
  0x5d   :  { %v2744_v10 = vld [vmem:[#allocation5 + $0x420] sm:$0xf0]  ;;  %v2431_v50 = vor.u32 %v3306_v41, %v2430_v40  ;;  %v2942_v5 = vld [vmem:[#allocation5 + $0x588] sm:$0xf]  ;;  %v3135_v41 = vor.u32 %v3482_v33, %v3134_v32 }
  0x5e   :  { %1794 = vmatpush.bf16.msra.mxu1 %v2587_v30  ;;  %1821 = vmatpush.bf16.msra.mxu3 %v3131_v36  ;;  %v2747_v11 = vor.u32 %v3381_v9, %v2744_v10  ;;  %v3445_v12 = vld [vmem:[#allocation5 + $0x604] sm:$0xf]  ;;  %v3434_v6 = vld [vmem:[#allocation5 + $0x5a4] sm:$0xf0] }
  0x5f   :  { %v3000_v13 = vld [vmem:[#allocation5 + $0x620] sm:$0xf0]  ;;  %v3198_v10 = vld [vmem:[#allocation5 + $0x788] sm:$0xf] }
  0x60   :  { %1808 = vmatpush.bf16.msra.mxu2 %v2843_v46  ;;  %1782 = vmatpush.bf16.msra.mxu0 %v2267_v51  ;;  %v3003_v14 = vor.u32 %v3445_v12, %v3000_v13  ;;  %v2974_v51 = vld [vmem:[#allocation5 + $0x5c8] sm:$0xf] }
  0x61   :  { %v2366_v12 = vld [vmem:[#allocation5 + $0x108] sm:$0xf] }
  0x62   :  { %1795 = vmatpush.bf16.msra.mxu1 %v2555_v42  ;;  %1822 = vmatpush.bf16.msra.mxu3 %v3099_v48  ;;  %v3290_v13 = vld [vmem:[#allocation5 + $0x124] sm:$0xf0] }
  0x63   :  { %v3354_v15 = vld [vmem:[#allocation5 + $0x324] sm:$0xf0] }
  0x64   :  { %1809 = vmatpush.bf16.msra.mxu2 %v2811_v58  ;;  %1783 = vmatpush.bf16.msra.mxu0 %v2235_v0  ;;  %v2398_v58 = vld [vmem:[#allocation5 + $0x148] sm:$0xf] }
  0x65   :  { %v2399_v4 = vor.u32 %v3298_v59, %v2398_v58  ;;  %v3070_v58 = vld [vmem:[#allocation5 + $0x688] sm:$0xf] }
  0x66   :  { %1796 = vmatpush.bf16.msra.mxu1 %v2523_v54  ;;  %1823 = vmatpush.bf16.msra.mxu3 %v3067_v60  ;;  %v2654_v60 = vld [vmem:[#allocation5 + $0x348] sm:$0xf] }
  0x67   :  { %v2655_v9 = vor.u32 %v3362_v61, %v2654_v60  ;;  %v3466_v59 = vld [vmem:[#allocation5 + $0x6a4] sm:$0xf0] }
  0x68   :  { %1810 = vmatpush.bf16.msra.mxu2 %v2779_v7 }
  0x6a   :  { %1797 = vmatpush.bf16.msra.mxu1 %v2491_v2  ;;  %1824 = vmatpush.bf16.msra.mxu3 %v3035_v8  ;;  %v2975_v2 = vor.u32 %v3442_v52, %v2974_v51  ;;  %v3266_v51 = vld [vmem:[#allocation5 + $0x64] sm:$0xf0] }
  0x6b   :  { %v2526_v52 = vld [vmem:[#allocation5 + $0x248] sm:$0xf] }
  0x6c   :  { %1811 = vmatpush.bf16.msra.mxu2 %v2747_v11  ;;  %v3498_v11 = vld [vmem:[#allocation5 + $0x7a4] sm:$0xf0]  ;;  %v2527_v61 = vor.u32 %v3330_v53, %v2526_v52  ;;  %v3350_v52 = vld [vmem:[#allocation5 + $0x30c] sm:$0xf] }
  0x6d   :  { %v2624_v53 = vld [vmem:[#allocation5 + $0x328] sm:$0xf0] }
  0x6e   :  { %1825 = vmatpush.bf16.msra.mxu3 %v3003_v14  ;;  %v2622_v14 = vld [vmem:[#allocation5 + $0x308] sm:$0xf] }
  0x91   :  { %v107_v16 = vpop.f32.mrf.mxu0  ;;  %v121_v17 = vpop.f32.mrf.mxu1 }
  0x92   :  { %v108_v20 = vadd.f32 %v107_v16, %v58_v18  ;;  %v122_v21 = vadd.f32 %v121_v17, %v59_v19  ;;  %v2943_v16 = vor.u32 %v3434_v6, %v2942_v5  ;;  %v3199_v17 = vor.u32 %v3498_v11, %v3198_v10  ;;  %v3374_v6 = vld [vmem:[#allocation5 + $0x3cc] sm:$0xf]  ;;  %v2782_v10 = vld [vmem:[#allocation5 + $0x448] sm:$0xf] }
  0x93   :  { %v3071_v5 = vor.u32 %v3466_v59, %v3070_v58  ;;  %v3394_v11 = vld [vmem:[#allocation5 + $0x464] sm:$0xf0]  ;;  %v3486_v58 = vld [vmem:[#allocation5 + $0x74c] sm:$0xf] }
  0x94   :  { %v154_v28 = vmax.f32 %v108_v20, 0.0  ;;  %v155_v29 = vmax.f32 %v122_v21, 0.0  ;;  %v2623_v20 = vor.u32 %v3354_v15, %v2622_v14  ;;  %v3426_v21 = vld [vmem:[#allocation5 + $0x564] sm:$0xf0]  ;;  %v3168_v59 = vld [vmem:[#allocation5 + $0x768] sm:$0xf0] }
  0x99   :  { %v135_v22 = vpop.f32.mrf.mxu2  ;;  %v149_v23 = vpop.f32.mrf.mxu3 }
  0x9a   :  { %v109_v24 = vpop.f32.mrf.mxu0  ;;  %v123_v25 = vpop.f32.mrf.mxu1  ;;  %v136_v46 = vadd.f32 %v135_v22, %v60_v34  ;;  %v150_v47 = vadd.f32 %v149_v23, %v61_v35  ;;  %v3166_v22 = vld [vmem:[#allocation5 + $0x748] sm:$0xf] }
  0x9b   :  { %v110_v30 = vadd.f32 %v109_v24, %v58_v18  ;;  %v124_v31 = vadd.f32 %v123_v25, %v59_v19  ;;  %v2910_v18 = vld [vmem:[#allocation5 + $0x548] sm:$0xf]  ;;  %v2367_v19 = vor.u32 %v3290_v13, %v2366_v12 }
  0x9c   :  { %v156_v62 = vmax.f32 %v136_v46, 0.0  ;;  %v157_v63 = vmax.f32 %v150_v47, 0.0  ;;  %v3490_v23 = vld [vmem:[#allocation5 + $0x764] sm:$0xf0] }
  0x9d   :  { %v158_v36 = vmax.f32 %v110_v30, 0.0  ;;  %v159_v37 = vmax.f32 %v124_v31, 0.0  ;;  %v2334_v24 = vld [vmem:[#allocation5 + $0xc8] sm:$0xf] }
  0x9e   :  { %v3282_v25 = vld [vmem:[#allocation5 + $0xe4] sm:$0xf0] }
  0x9f   :  { %v3650_v42 = vpack.c.bf16 %v158_v36, %v154_v28  ;;  %v3652_v43 = vpack.c.bf16 %v159_v37, %v155_v29  ;;  %v2911_v28 = vor.u32 %v3426_v21, %v2910_v18  ;;  %v3167_v29 = vor.u32 %v3490_v23, %v3166_v22  ;;  %v2878_v30 = vld [vmem:[#allocation5 + $0x508] sm:$0xf]  ;;  %v3302_v18 = vld [vmem:[#allocation5 + $0x18c] sm:$0xf] }
  0xa0   :  { %v3418_v31 = vld [vmem:[#allocation5 + $0x524] sm:$0xf0]  ;;  %v2783_v21 = vor.u32 %v3394_v11, %v2782_v10  ;;  %v2688_v23 = vld [vmem:[#allocation5 + $0x3a8] sm:$0xf0] }
  0xa1   :  { %v137_v48 = vpop.f32.mrf.mxu2  ;;  %v151_v49 = vpop.f32.mrf.mxu3  ;;  %1728 = vmatmul.bf16.vlgmr.msrb.gmra.mxu0 %v3650_v42  ;;  %1742 = vmatmul.bf16.vlgmr.msrb.gmra.mxu1 %v3652_v43  ;;  %v2302_v36 = vld [vmem:[#allocation5 + $0x88] sm:$0xf]  ;;  %v2879_v40 = vor.u32 %v3418_v31, %v2878_v30  ;;  %v3502_v30 = vld [vmem:[#allocation5 + $0x7cc] sm:$0xf] }
  0xa2   :  { %v138_v54 = vadd.f32 %v137_v48, %v60_v34  ;;  %v152_v55 = vadd.f32 %v151_v49, %v61_v35  ;;  %1832 = vmatpush.bf16.msrb.mxu0 %v2463_v38  ;;  %1846 = vmatpush.bf16.msrb.mxu1 %v2719_v39  ;;  %v2335_v34 = vor.u32 %v3282_v25, %v2334_v24  ;;  %v3274_v37 = vld [vmem:[#allocation5 + $0xa4] sm:$0xf0]  ;;  %v3232_v31 = vld [vmem:[#allocation5 + $0x7e8] sm:$0xf0] }
  0xa3   :  { %v2591_v35 = vor.u32 %v3346_v27, %v2590_v26  ;;  %v2558_v38 = vld [vmem:[#allocation5 + $0x288] sm:$0xf]  ;;  %v2303_v48 = vor.u32 %v3274_v37, %v2302_v36  ;;  %v2400_v37 = vld [vmem:[#allocation5 + $0x168] sm:$0xf0] }
  0xa4   :  { %v160_v0 = vmax.f32 %v138_v54, 0.0  ;;  %v161_v1 = vmax.f32 %v152_v55, 0.0  ;;  %v3338_v39 = vld [vmem:[#allocation5 + $0x2a4] sm:$0xf0]  ;;  %v2847_v54 = vor.u32 %v3410_v45, %v2846_v44  ;;  %v3430_v44 = vld [vmem:[#allocation5 + $0x58c] sm:$0xf] }
  0xa5   :  { %v3102_v46 = vld [vmem:[#allocation5 + $0x6c8] sm:$0xf]  ;;  %v2559_v49 = vor.u32 %v3338_v39, %v2558_v38  ;;  %v3358_v38 = vld [vmem:[#allocation5 + $0x34c] sm:$0xf] }
  0xa6   :  { %v3656_v7 = vpack.c.bf16 %v160_v0, %v156_v62  ;;  %v3658_v8 = vpack.c.bf16 %v161_v1, %v157_v63  ;;  %1833 = vmatpush.bf16.msrb.mxu0 %v2431_v50  ;;  %1847 = vmatpush.bf16.msrb.mxu1 %v2687_v56  ;;  %v3474_v47 = vld [vmem:[#allocation5 + $0x6e4] sm:$0xf0]  ;;  %v2656_v39 = vld [vmem:[#allocation5 + $0x368] sm:$0xf0] }
  0xa7   :  { %v2270_v50 = vld [vmem:[#allocation5 + $0x48] sm:$0xf]  ;;  %v3103_v55 = vor.u32 %v3474_v47, %v3102_v46  ;;  %v2944_v45 = vld [vmem:[#allocation5 + $0x5a8] sm:$0xf0] }
  0xa8   :  { %1756 = vmatmul.bf16.vlgmr.msrb.gmra.mxu2 %v3656_v7  ;;  %1770 = vmatmul.bf16.vlgmr.msrb.gmra.mxu3 %v3658_v8  ;;  %v2814_v56 = vld [vmem:[#allocation5 + $0x488] sm:$0xf]  ;;  %v2271_v60 = vor.u32 %v3266_v51, %v2270_v50  ;;  %v3494_v46 = vld [vmem:[#allocation5 + $0x78c] sm:$0xf] }
  0xa9   :  { %1860 = vmatpush.bf16.msrb.mxu2 %v2975_v2  ;;  %1874 = vmatpush.bf16.msrb.mxu3 %v3231_v3  ;;  %v2238_v62 = vld [vmem:[#allocation5 + $0x8] sm:$0xf]  ;;  %v3310_v2 = vld [vmem:[#allocation5 + $0x1cc] sm:$0xf] }
  0xaa   :  { %1834 = vmatpush.bf16.msrb.mxu0 %v2399_v4  ;;  %1848 = vmatpush.bf16.msrb.mxu1 %v2655_v9  ;;  %v3258_v63 = vld [vmem:[#allocation5 + $0x24] sm:$0xf0]  ;;  %v2464_v3 = vld [vmem:[#allocation5 + $0x1e8] sm:$0xf0]  ;;  %v2815_v4 = vor.u32 %v3402_v57, %v2814_v56 }
  0xab   :  { %v2494_v0 = vld [vmem:[#allocation5 + $0x208] sm:$0xf]  ;;  %v2720_v9 = vld [vmem:[#allocation5 + $0x3e8] sm:$0xf0]  ;;  %v2239_v14 = vor.u32 %v3258_v63, %v2238_v62 }
  0xac   :  { %v3322_v1 = vld [vmem:[#allocation5 + $0x224] sm:$0xf0]  ;;  %v3200_v47 = vld [vmem:[#allocation5 + $0x7a8] sm:$0xf0] }
  0xad   :  { %1861 = vmatpush.bf16.msrb.mxu2 %v2943_v16  ;;  %1875 = vmatpush.bf16.msrb.mxu3 %v3199_v17  ;;  %v3038_v12 = vld [vmem:[#allocation5 + $0x648] sm:$0xf]  ;;  %v2495_v15 = vor.u32 %v3322_v1, %v2494_v0  ;;  %v2467_v16 = vor.u32 %v3310_v2, %v2464_v3  ;;  %v2723_v17 = vor.u32 %v3374_v6, %v2720_v9  ;;  %v3286_v50 = vld [vmem:[#allocation5 + $0x10c] sm:$0xf] }
  0xae   :  { %1835 = vmatpush.bf16.msrb.mxu0 %v2367_v19  ;;  %1849 = vmatpush.bf16.msrb.mxu1 %v2623_v20  ;;  %v3458_v13 = vld [vmem:[#allocation5 + $0x664] sm:$0xf0]  ;;  %v2432_v19 = vld [vmem:[#allocation5 + $0x1a8] sm:$0xf0]  ;;  %v3171_v3 = vor.u32 %v3486_v58, %v3168_v59  ;;  %v2694_v58 = vld [vmem:[#allocation5 + $0x390] sm:$0xf] }
  0xaf   :  { %v3366_v20 = vld [vmem:[#allocation5 + $0x38c] sm:$0xf]  ;;  %v3039_v22 = vor.u32 %v3458_v13, %v3038_v12  ;;  %v2750_v24 = vld [vmem:[#allocation5 + $0x408] sm:$0xf]  ;;  %v2435_v32 = vor.u32 %v3302_v18, %v2432_v19 }
  0xb0   :  { %v3386_v25 = vld [vmem:[#allocation5 + $0x424] sm:$0xf0]  ;;  %v2691_v33 = vor.u32 %v3366_v20, %v2688_v23  ;;  %v2368_v51 = vld [vmem:[#allocation5 + $0x128] sm:$0xf0] }
  0xb1   :  { %1862 = vmatpush.bf16.msrb.mxu2 %v2911_v28  ;;  %1876 = vmatpush.bf16.msrb.mxu3 %v3167_v29  ;;  %v3006_v26 = vld [vmem:[#allocation5 + $0x608] sm:$0xf]  ;;  %v3438_v28 = vld [vmem:[#allocation5 + $0x5cc] sm:$0xf] }
  0xb2   :  { %1784 = vmatmul.bf16.vlgmr.msra.gmra.mxu0 %v3650_v42  ;;  %1798 = vmatmul.bf16.vlgmr.msra.gmra.mxu1 %v3652_v43  ;;  %v3450_v27 = vld [vmem:[#allocation5 + $0x624] sm:$0xf0]  ;;  %v2976_v29 = vld [vmem:[#allocation5 + $0x5e8] sm:$0xf0] }
  0xb3   :  { %1836 = vmatpush.bf16.msrb.mxu0 %v2335_v34  ;;  %1850 = vmatpush.bf16.msrb.mxu1 %v2591_v35  ;;  %v3294_v34 = vld [vmem:[#allocation5 + $0x14c] sm:$0xf]  ;;  %v2751_v35 = vor.u32 %v3386_v25, %v2750_v24  ;;  %v3007_v36 = vor.u32 %v3450_v27, %v3006_v26 }
  0xb4   :  { %v3422_v56 = vld [vmem:[#allocation5 + $0x54c] sm:$0xf] }
  0xb5   :  { %1863 = vmatpush.bf16.msrb.mxu2 %v2879_v40  ;;  %1877 = vmatpush.bf16.msrb.mxu3 %v3135_v41  ;;  %v2979_v40 = vor.u32 %v3438_v28, %v2976_v29  ;;  %v3235_v41 = vor.u32 %v3502_v30, %v3232_v31  ;;  %v2912_v57 = vld [vmem:[#allocation5 + $0x568] sm:$0xf0] }
  0xb6   :  { %v3278_v62 = vld [vmem:[#allocation5 + $0xcc] sm:$0xf]  ;;  %v2915_v2 = vor.u32 %v3422_v56, %v2912_v57  ;;  %v2438_v56 = vld [vmem:[#allocation5 + $0x190] sm:$0xf] }
  0xb7   :  { %1837 = vmatpush.bf16.msrb.mxu0 %v2303_v48  ;;  %1851 = vmatpush.bf16.msrb.mxu1 %v2559_v49  ;;  %v2403_v48 = vor.u32 %v3294_v34, %v2400_v37  ;;  %v2659_v49 = vor.u32 %v3358_v38, %v2656_v39  ;;  %v2336_v63 = vld [vmem:[#allocation5 + $0xe8] sm:$0xf0]  ;;  %v3307_v57 = vld [vmem:[#allocation5 + $0x1ac] sm:$0xf0] }
  0xb8   :  { %1812 = vmatmul.bf16.vlgmr.msra.gmra.mxu2 %v3656_v7  ;;  %1826 = vmatmul.bf16.vlgmr.msra.gmra.mxu3 %v3658_v8  ;;  %v3342_v0 = vld [vmem:[#allocation5 + $0x2cc] sm:$0xf]  ;;  %v2339_v10 = vor.u32 %v3278_v62, %v2336_v63 }
  0xb9   :  { %1864 = vmatpush.bf16.msrb.mxu2 %v2847_v54  ;;  %1878 = vmatpush.bf16.msrb.mxu3 %v3103_v55  ;;  %v2947_v54 = vor.u32 %v3430_v44, %v2944_v45  ;;  %v3203_v55 = vor.u32 %v3494_v46, %v3200_v47  ;;  %v2592_v1 = vld [vmem:[#allocation5 + $0x2e8] sm:$0xf0]  ;;  %v2726_v46 = vld [vmem:[#allocation5 + $0x3d0] sm:$0xf] }
  0xba   :  { %v3478_v6 = vld [vmem:[#allocation5 + $0x70c] sm:$0xf]  ;;  %v2595_v11 = vor.u32 %v3342_v0, %v2592_v1  ;;  %v3379_v47 = vld [vmem:[#allocation5 + $0x3ec] sm:$0xf0] }
  0xbb   :  { %1838 = vmatpush.bf16.msrb.mxu0 %v2271_v60  ;;  %1852 = vmatpush.bf16.msrb.mxu1 %v2527_v61  ;;  %v2371_v60 = vor.u32 %v3286_v50, %v2368_v51  ;;  %v2627_v61 = vor.u32 %v3350_v52, %v2624_v53  ;;  %v3136_v9 = vld [vmem:[#allocation5 + $0x728] sm:$0xf0] }
  0xbc   :  { %v3270_v12 = vld [vmem:[#allocation5 + $0x8c] sm:$0xf] }
  0xbd   :  { %1865 = vmatpush.bf16.msrb.mxu2 %v2815_v4  ;;  %1879 = vmatpush.bf16.msrb.mxu3 %v3071_v5  ;;  %v3414_v4 = vld [vmem:[#allocation5 + $0x50c] sm:$0xf] }
  0xbe   :  { %v2880_v5 = vld [vmem:[#allocation5 + $0x528] sm:$0xf0] }
  0xbf   :  { %1839 = vmatpush.bf16.msrb.mxu0 %v2239_v14  ;;  %1853 = vmatpush.bf16.msrb.mxu1 %v2495_v15  ;;  %v2304_v13 = vld [vmem:[#allocation5 + $0xa8] sm:$0xf0] }
  0xc0   :  { %v3334_v14 = vld [vmem:[#allocation5 + $0x28c] sm:$0xf] }
  0xc1   :  { %1866 = vmatpush.bf16.msrb.mxu2 %v2783_v21  ;;  %1880 = vmatpush.bf16.msrb.mxu3 %v3039_v22  ;;  %v2560_v15 = vld [vmem:[#allocation5 + $0x2a8] sm:$0xf0]  ;;  %v2307_v22 = vor.u32 %v3270_v12, %v2304_v13  ;;  %v2406_v12 = vld [vmem:[#allocation5 + $0x150] sm:$0xf] }
  0xc2   :  { %1840 = vmatmul.bf16.vlgmr.msrb.gmra.mxu0 %v3650_v42  ;;  %1854 = vmatmul.bf16.vlgmr.msrb.gmra.mxu1 %v3652_v43  ;;  %v3406_v18 = vld [vmem:[#allocation5 + $0x4cc] sm:$0xf]  ;;  %v2563_v23 = vor.u32 %v3334_v14, %v2560_v15  ;;  %v3299_v13 = vld [vmem:[#allocation5 + $0x16c] sm:$0xf0] }
  0xc3   :  { %1888 = vmatpush.bf16.msra.mxu0 %v2467_v16  ;;  %1902 = vmatpush.bf16.msra.mxu1 %v2723_v17  ;;  %v2883_v16 = vor.u32 %v3414_v4, %v2880_v5  ;;  %v3139_v17 = vor.u32 %v3478_v6, %v3136_v9  ;;  %v2848_v19 = vld [vmem:[#allocation5 + $0x4e8] sm:$0xf0]  ;;  %v3238_v4 = vld [vmem:[#allocation5 + $0x7d0] sm:$0xf]  ;;  %v2439_v6 = vor.u32 %v3307_v57, %v2438_v56 }
  0xc4   :  { %v3470_v20 = vld [vmem:[#allocation5 + $0x6cc] sm:$0xf]  ;;  %v2851_v28 = vor.u32 %v3406_v18, %v2848_v19  ;;  %v3507_v5 = vld [vmem:[#allocation5 + $0x7ec] sm:$0xf0] }
  0xc5   :  { %1867 = vmatpush.bf16.msrb.mxu2 %v2751_v35  ;;  %1881 = vmatpush.bf16.msrb.mxu3 %v3007_v36  ;;  %v3104_v21 = vld [vmem:[#allocation5 + $0x6e8] sm:$0xf0]  ;;  %v3239_v15 = vor.u32 %v3507_v5, %v3238_v4  ;;  %v2950_v18 = vld [vmem:[#allocation5 + $0x590] sm:$0xf] }
  0xc6   :  { %v3262_v24 = vld [vmem:[#allocation5 + $0x4c] sm:$0xf]  ;;  %v3107_v29 = vor.u32 %v3470_v20, %v3104_v21  ;;  %v3435_v19 = vld [vmem:[#allocation5 + $0x5ac] sm:$0xf0] }
  0xc7   :  { %1889 = vmatpush.bf16.msra.mxu0 %v2435_v32  ;;  %1903 = vmatpush.bf16.msra.mxu1 %v2691_v33  ;;  %v2272_v25 = vld [vmem:[#allocation5 + $0x68] sm:$0xf0]  ;;  %v3206_v20 = vld [vmem:[#allocation5 + $0x790] sm:$0xf] }
  0xc8   :  { %1868 = vmatmul.bf16.vlgmr.msrb.gmra.mxu2 %v3656_v7  ;;  %1882 = vmatmul.bf16.vlgmr.msrb.gmra.mxu3 %v3658_v8  ;;  %v3326_v26 = vld [vmem:[#allocation5 + $0x24c] sm:$0xf]  ;;  %v2275_v34 = vor.u32 %v3262_v24, %v2272_v25  ;;  %v3499_v21 = vld [vmem:[#allocation5 + $0x7ac] sm:$0xf0] }
  0xc9   :  { %1916 = vmatpush.bf16.msra.mxu2 %v2979_v40  ;;  %1930 = vmatpush.bf16.msra.mxu3 %v3235_v41  ;;  %v2528_v27 = vld [vmem:[#allocation5 + $0x268] sm:$0xf0]  ;;  %v2470_v40 = vld [vmem:[#allocation5 + $0x1d0] sm:$0xf] }
  0xca   :  { %v3398_v30 = vld [vmem:[#allocation5 + $0x48c] sm:$0xf]  ;;  %v2531_v35 = vor.u32 %v3326_v26, %v2528_v27  ;;  %v3315_v41 = vld [vmem:[#allocation5 + $0x1ec] sm:$0xf0]  ;;  %v2951_v26 = vor.u32 %v3435_v19, %v2950_v18  ;;  %v3207_v27 = vor.u32 %v3499_v21, %v3206_v20  ;;  %v3311_v18 = vld [vmem:[#allocation5 + $0x1d4] sm:$0xf] }
  0xcb   :  { %1890 = vmatpush.bf16.msra.mxu0 %v2403_v48  ;;  %1904 = vmatpush.bf16.msra.mxu1 %v2659_v49  ;;  %v2816_v31 = vld [vmem:[#allocation5 + $0x4a8] sm:$0xf0]  ;;  %v2374_v24 = vld [vmem:[#allocation5 + $0x110] sm:$0xf]  ;;  %v2472_v19 = vld [vmem:[#allocation5 + $0x1f0] sm:$0xf0] }
  0xcc   :  { %v3462_v32 = vld [vmem:[#allocation5 + $0x68c] sm:$0xf]  ;;  %v2819_v44 = vor.u32 %v3398_v30, %v2816_v31  ;;  %v3291_v25 = vld [vmem:[#allocation5 + $0x12c] sm:$0xf0]  ;;  %v3375_v20 = vld [vmem:[#allocation5 + $0x3d4] sm:$0xf] }
  0xcd   :  { %1917 = vmatpush.bf16.msra.mxu2 %v2947_v54  ;;  %1931 = vmatpush.bf16.msra.mxu3 %v3203_v55  ;;  %v3072_v33 = vld [vmem:[#allocation5 + $0x6a8] sm:$0xf0]  ;;  %v2471_v54 = vor.u32 %v3315_v41, %v2470_v40  ;;  %v2727_v55 = vor.u32 %v3379_v47, %v2726_v46  ;;  %v2918_v30 = vld [vmem:[#allocation5 + $0x550] sm:$0xf]  ;;  %v2728_v21 = vld [vmem:[#allocation5 + $0x3f0] sm:$0xf0] }
  0xce   :  { %v3254_v36 = vld [vmem:[#allocation5 + $0xc] sm:$0xf]  ;;  %v3075_v45 = vor.u32 %v3462_v32, %v3072_v33  ;;  %v3427_v31 = vld [vmem:[#allocation5 + $0x56c] sm:$0xf0] }
  0xcf   :  { %1891 = vmatpush.bf16.msra.mxu0 %v2371_v60  ;;  %1905 = vmatpush.bf16.msra.mxu1 %v2627_v61  ;;  %v2240_v37 = vld [vmem:[#allocation5 + $0x28] sm:$0xf0]  ;;  %v3371_v61 = vld [vmem:[#allocation5 + $0x3ac] sm:$0xf0] }
  0xd0   :  { %v3318_v38 = vld [vmem:[#allocation5 + $0x20c] sm:$0xf]  ;;  %v2243_v52 = vor.u32 %v3254_v36, %v2240_v37  ;;  %v2695_v9 = vor.u32 %v3371_v61, %v2694_v58  ;;  %v3174_v32 = vld [vmem:[#allocation5 + $0x750] sm:$0xf] }
  0xd1   :  { %1918 = vmatpush.bf16.msra.mxu2 %v2915_v2  ;;  %1932 = vmatpush.bf16.msra.mxu3 %v3171_v3  ;;  %v2496_v39 = vld [vmem:[#allocation5 + $0x228] sm:$0xf0]  ;;  %v2982_v2 = vld [vmem:[#allocation5 + $0x5d0] sm:$0xf] }
  0xd2   :  { %v3390_v48 = vld [vmem:[#allocation5 + $0x44c] sm:$0xf]  ;;  %v2499_v53 = vor.u32 %v3318_v38, %v2496_v39  ;;  %v3443_v3 = vld [vmem:[#allocation5 + $0x5ec] sm:$0xf0]  ;;  %v2919_v38 = vor.u32 %v3427_v31, %v2918_v30  ;;  %v3303_v30 = vld [vmem:[#allocation5 + $0x194] sm:$0xf] }
  0xd3   :  { %1892 = vmatpush.bf16.msra.mxu0 %v2339_v10  ;;  %1906 = vmatpush.bf16.msra.mxu1 %v2595_v11  ;;  %v2784_v49 = vld [vmem:[#allocation5 + $0x468] sm:$0xf0]  ;;  %v2983_v14 = vor.u32 %v3443_v3, %v2982_v2  ;;  %v3491_v33 = vld [vmem:[#allocation5 + $0x76c] sm:$0xf0]  ;;  %v2440_v31 = vld [vmem:[#allocation5 + $0x1b0] sm:$0xf0] }
  0xd4   :  { %v3454_v50 = vld [vmem:[#allocation5 + $0x64c] sm:$0xf]  ;;  %v2787_v59 = vor.u32 %v3390_v48, %v2784_v49  ;;  %v2342_v36 = vld [vmem:[#allocation5 + $0xd0] sm:$0xf]  ;;  %v3175_v39 = vor.u32 %v3491_v33, %v3174_v32  ;;  %v3367_v32 = vld [vmem:[#allocation5 + $0x394] sm:$0xf] }
  0xd5   :  { %1919 = vmatpush.bf16.msra.mxu2 %v2883_v16  ;;  %1933 = vmatpush.bf16.msra.mxu3 %v3139_v17  ;;  %v3040_v51 = vld [vmem:[#allocation5 + $0x668] sm:$0xf0]  ;;  %v2662_v16 = vld [vmem:[#allocation5 + $0x350] sm:$0xf] }
  0xd6   :  { %v3043_v60 = vor.u32 %v3454_v50, %v3040_v51  ;;  %v3382_v62 = vld [vmem:[#allocation5 + $0x40c] sm:$0xf]  ;;  %v3363_v17 = vld [vmem:[#allocation5 + $0x36c] sm:$0xf0] }
  0xd7   :  { %1893 = vmatpush.bf16.msra.mxu0 %v2307_v22  ;;  %1907 = vmatpush.bf16.msra.mxu1 %v2563_v23  ;;  %v2752_v63 = vld [vmem:[#allocation5 + $0x428] sm:$0xf0]  ;;  %v2407_v22 = vor.u32 %v3299_v13, %v2406_v12  ;;  %v2663_v23 = vor.u32 %v3363_v17, %v2662_v16  ;;  %v3283_v37 = vld [vmem:[#allocation5 + $0xec] sm:$0xf0] }
  0xd8   :  { %v3446_v0 = vld [vmem:[#allocation5 + $0x60c] sm:$0xf]  ;;  %v2755_v10 = vor.u32 %v3382_v62, %v2752_v63  ;;  %v2598_v40 = vld [vmem:[#allocation5 + $0x2d0] sm:$0xf]  ;;  %v2343_v48 = vor.u32 %v3283_v37, %v2342_v36 }
  0xd9   :  { %1920 = vmatpush.bf16.msra.mxu2 %v2851_v28  ;;  %1934 = vmatpush.bf16.msra.mxu3 %v3107_v29  ;;  %v3008_v1 = vld [vmem:[#allocation5 + $0x628] sm:$0xf0]  ;;  %v2630_v28 = vld [vmem:[#allocation5 + $0x310] sm:$0xf] }
  0xda   :  { %v3011_v11 = vor.u32 %v3446_v0, %v3008_v1  ;;  %v3355_v29 = vld [vmem:[#allocation5 + $0x32c] sm:$0xf0] }
  0xdb   :  { %1894 = vmatpush.bf16.msra.mxu0 %v2275_v34  ;;  %1908 = vmatpush.bf16.msra.mxu1 %v2531_v35  ;;  %v2375_v34 = vor.u32 %v3291_v25, %v2374_v24  ;;  %v2631_v35 = vor.u32 %v3355_v29, %v2630_v28  ;;  %v3347_v41 = vld [vmem:[#allocation5 + $0x2ec] sm:$0xf0]  ;;  %v2475_v28 = vor.u32 %v3311_v18, %v2472_v19  ;;  %v3415_v18 = vld [vmem:[#allocation5 + $0x514] sm:$0xf] }
  0xdc   :  { %v3142_v46 = vld [vmem:[#allocation5 + $0x710] sm:$0xf]  ;;  %v2599_v49 = vor.u32 %v3347_v41, %v2598_v40  ;;  %v2731_v29 = vor.u32 %v3375_v20, %v2728_v21  ;;  %v3439_v40 = vld [vmem:[#allocation5 + $0x5d4] sm:$0xf] }
  0xdd   :  { %1921 = vmatpush.bf16.msra.mxu2 %v2819_v44  ;;  %1935 = vmatpush.bf16.msra.mxu3 %v3075_v45  ;;  %v2886_v44 = vld [vmem:[#allocation5 + $0x510] sm:$0xf]  ;;  %v2984_v41 = vld [vmem:[#allocation5 + $0x5f0] sm:$0xf0] }
  0xde   :  { %v3419_v45 = vld [vmem:[#allocation5 + $0x52c] sm:$0xf0]  ;;  %v2888_v19 = vld [vmem:[#allocation5 + $0x530] sm:$0xf0] }
  0xdf   :  { %1895 = vmatpush.bf16.msra.mxu0 %v2243_v52  ;;  %1909 = vmatpush.bf16.msra.mxu1 %v2499_v53  ;;  %v3483_v47 = vld [vmem:[#allocation5 + $0x72c] sm:$0xf0]  ;;  %v2887_v52 = vor.u32 %v3419_v45, %v2886_v44  ;;  %v3503_v44 = vld [vmem:[#allocation5 + $0x7d4] sm:$0xf] }
  0xe0   :  { %v2310_v50 = vld [vmem:[#allocation5 + $0x90] sm:$0xf]  ;;  %v3143_v53 = vor.u32 %v3483_v47, %v3142_v46  ;;  %v3240_v45 = vld [vmem:[#allocation5 + $0x7f0] sm:$0xf0]  ;;  %v2443_v46 = vor.u32 %v3303_v30, %v2440_v31 }
  0xe1   :  { %1922 = vmatpush.bf16.msra.mxu2 %v2787_v59  ;;  %1936 = vmatpush.bf16.msra.mxu3 %v3043_v60  ;;  %v3275_v51 = vld [vmem:[#allocation5 + $0xac] sm:$0xf0]  ;;  %v3479_v20 = vld [vmem:[#allocation5 + $0x714] sm:$0xf] }
  0xe2   :  { %1896 = vmatmul.bf16.vlgmr.msra.gmra.mxu0 %v3650_v42  ;;  %1910 = vmatmul.bf16.vlgmr.msra.gmra.mxu1 %v3652_v43  ;;  %v2854_v56 = vld [vmem:[#allocation5 + $0x4d0] sm:$0xf]  ;;  %v2311_v60 = vor.u32 %v3275_v51, %v2310_v50  ;;  %v3295_v50 = vld [vmem:[#allocation5 + $0x154] sm:$0xf] }
  0xe3   :  { %1944 = vmatpush.bf16.msrb.mxu0 %v2471_v54  ;;  %1958 = vmatpush.bf16.msrb.mxu1 %v2727_v55  ;;  %v2566_v54 = vld [vmem:[#allocation5 + $0x290] sm:$0xf]  ;;  %v2408_v51 = vld [vmem:[#allocation5 + $0x170] sm:$0xf0] }
  0xe4   :  { %v3339_v55 = vld [vmem:[#allocation5 + $0x2ac] sm:$0xf0]  ;;  %v3144_v21 = vld [vmem:[#allocation5 + $0x730] sm:$0xf0] }
  0xe5   :  { %1923 = vmatpush.bf16.msra.mxu2 %v2755_v10  ;;  %1937 = vmatpush.bf16.msra.mxu3 %v3011_v11  ;;  %v3411_v57 = vld [vmem:[#allocation5 + $0x4ec] sm:$0xf0]  ;;  %v2567_v61 = vor.u32 %v3339_v55, %v2566_v54  ;;  %v3359_v54 = vld [vmem:[#allocation5 + $0x354] sm:$0xf] }
  0xe6   :  { %v3110_v58 = vld [vmem:[#allocation5 + $0x6d0] sm:$0xf]  ;;  %v2855_v0 = vor.u32 %v3411_v57, %v2854_v56  ;;  %v2664_v55 = vld [vmem:[#allocation5 + $0x370] sm:$0xf0] }
  0xe7   :  { %1945 = vmatpush.bf16.msrb.mxu0 %v2439_v6  ;;  %1959 = vmatpush.bf16.msrb.mxu1 %v2695_v9  ;;  %v3475_v59 = vld [vmem:[#allocation5 + $0x6ec] sm:$0xf0]  ;;  %v3431_v56 = vld [vmem:[#allocation5 + $0x594] sm:$0xf] }
  0xe8   :  { %1924 = vmatmul.bf16.vlgmr.msra.gmra.mxu2 %v3656_v7  ;;  %1938 = vmatmul.bf16.vlgmr.msra.gmra.mxu3 %v3658_v8  ;;  %v2278_v62 = vld [vmem:[#allocation5 + $0x50] sm:$0xf]  ;;  %v3111_v1 = vor.u32 %v3475_v59, %v3110_v58  ;;  %v2952_v57 = vld [vmem:[#allocation5 + $0x5b0] sm:$0xf0] }
  0xe9   :  { %1972 = vmatpush.bf16.msrb.mxu2 %v2983_v14  ;;  %1986 = vmatpush.bf16.msrb.mxu3 %v3239_v15  ;;  %v3267_v63 = vld [vmem:[#allocation5 + $0x6c] sm:$0xf0]  ;;  %v3495_v58 = vld [vmem:[#allocation5 + $0x794] sm:$0xf] }
  0xea   :  { %v2534_v2 = vld [vmem:[#allocation5 + $0x250] sm:$0xf]  ;;  %v2279_v10 = vor.u32 %v3267_v63, %v2278_v62  ;;  %v3208_v59 = vld [vmem:[#allocation5 + $0x7b0] sm:$0xf0] }
  0xeb   :  { %1946 = vmatpush.bf16.msrb.mxu0 %v2407_v22  ;;  %1960 = vmatpush.bf16.msrb.mxu1 %v2663_v23  ;;  %v3331_v3 = vld [vmem:[#allocation5 + $0x26c] sm:$0xf0]  ;;  %v3287_v62 = vld [vmem:[#allocation5 + $0x114] sm:$0xf] }
  0xec   :  { %v2822_v4 = vld [vmem:[#allocation5 + $0x490] sm:$0xf]  ;;  %v2535_v11 = vor.u32 %v3331_v3, %v2534_v2  ;;  %v2376_v63 = vld [vmem:[#allocation5 + $0x130] sm:$0xf0] }
  0xed   :  { %1973 = vmatpush.bf16.msrb.mxu2 %v2951_v26  ;;  %1987 = vmatpush.bf16.msrb.mxu3 %v3207_v27  ;;  %v3403_v5 = vld [vmem:[#allocation5 + $0x4ac] sm:$0xf0]  ;;  %v3351_v2 = vld [vmem:[#allocation5 + $0x314] sm:$0xf] }
  0xee   :  { %v3078_v6 = vld [vmem:[#allocation5 + $0x690] sm:$0xf]  ;;  %v2823_v15 = vor.u32 %v3403_v5, %v2822_v4  ;;  %v2632_v3 = vld [vmem:[#allocation5 + $0x330] sm:$0xf0] }
  0xef   :  { %1947 = vmatpush.bf16.msrb.mxu0 %v2375_v34  ;;  %1961 = vmatpush.bf16.msrb.mxu1 %v2631_v35  ;;  %v3467_v9 = vld [vmem:[#allocation5 + $0x6ac] sm:$0xf0]  ;;  %v2696_v35 = vld [vmem:[#allocation5 + $0x3b0] sm:$0xf0] }
  0xf0   :  { %v2246_v12 = vld [vmem:[#allocation5 + $0x10] sm:$0xf]  ;;  %v3079_v16 = vor.u32 %v3467_v9, %v3078_v6  ;;  %v2699_v47 = vor.u32 %v3367_v32, %v2696_v35  ;;  %v3423_v4 = vld [vmem:[#allocation5 + $0x554] sm:$0xf] }
  0xf1   :  { %1974 = vmatpush.bf16.msrb.mxu2 %v2919_v38  ;;  %1988 = vmatpush.bf16.msrb.mxu3 %v3175_v39  ;;  %v3259_v13 = vld [vmem:[#allocation5 + $0x2c] sm:$0xf0]  ;;  %v2920_v5 = vld [vmem:[#allocation5 + $0x570] sm:$0xf0] }
  0xf2   :  { %v2502_v14 = vld [vmem:[#allocation5 + $0x210] sm:$0xf]  ;;  %v2247_v26 = vor.u32 %v3259_v13, %v2246_v12  ;;  %v3487_v6 = vld [vmem:[#allocation5 + $0x754] sm:$0xf] }
  0xf3   :  { %1948 = vmatpush.bf16.msrb.mxu0 %v2343_v48  ;;  %1962 = vmatpush.bf16.msrb.mxu1 %v2599_v49  ;;  %v3323_v17 = vld [vmem:[#allocation5 + $0x22c] sm:$0xf0]  ;;  %v3176_v9 = vld [vmem:[#allocation5 + $0x770] sm:$0xf0] }
  0xf4   :  { %v2790_v22 = vld [vmem:[#allocation5 + $0x450] sm:$0xf]  ;;  %v2503_v27 = vor.u32 %v3323_v17, %v2502_v14  ;;  %v3279_v12 = vld [vmem:[#allocation5 + $0xd4] sm:$0xf]  ;;  %v2923_v14 = vor.u32 %v3423_v4, %v2920_v5  ;;  %v2446_v4 = vld [vmem:[#allocation5 + $0x198] sm:$0xf] }
  0xf5   :  { %1975 = vmatpush.bf16.msrb.mxu2 %v2887_v52  ;;  %1989 = vmatpush.bf16.msrb.mxu3 %v3143_v53  ;;  %v3395_v23 = vld [vmem:[#allocation5 + $0x46c] sm:$0xf0]  ;;  %v2987_v52 = vor.u32 %v3439_v40, %v2984_v41  ;;  %v3243_v53 = vor.u32 %v3503_v44, %v3240_v45  ;;  %v2344_v13 = vld [vmem:[#allocation5 + $0xf0] sm:$0xf0]  ;;  %v3308_v5 = vld [vmem:[#allocation5 + $0x1b4] sm:$0xf0] }
  0xf6   :  { %v3046_v24 = vld [vmem:[#allocation5 + $0x650] sm:$0xf]  ;;  %v2791_v33 = vor.u32 %v3395_v23, %v2790_v22  ;;  %v2600_v17 = vld [vmem:[#allocation5 + $0x2f0] sm:$0xf0]  ;;  %v2347_v22 = vor.u32 %v3279_v12, %v2344_v13 }
  0xf7   :  { %1949 = vmatpush.bf16.msrb.mxu0 %v2311_v60  ;;  %1963 = vmatpush.bf16.msrb.mxu1 %v2567_v61  ;;  %v3459_v25 = vld [vmem:[#allocation5 + $0x66c] sm:$0xf0]  ;;  %v2411_v60 = vor.u32 %v3295_v50, %v2408_v51  ;;  %v2667_v61 = vor.u32 %v3359_v54, %v2664_v55  ;;  %v3407_v30 = vld [vmem:[#allocation5 + $0x4d4] sm:$0xf] }
  0xf8   :  { %v3047_v34 = vor.u32 %v3459_v25, %v3046_v24  ;;  %v2758_v36 = vld [vmem:[#allocation5 + $0x410] sm:$0xf]  ;;  %v3271_v24 = vld [vmem:[#allocation5 + $0x94] sm:$0xf] }
  0xf9   :  { %1976 = vmatpush.bf16.msrb.mxu2 %v2855_v0  ;;  %1990 = vmatpush.bf16.msrb.mxu3 %v3111_v1  ;;  %v3387_v37 = vld [vmem:[#allocation5 + $0x42c] sm:$0xf0]  ;;  %v2955_v0 = vor.u32 %v3431_v56, %v2952_v57  ;;  %v3211_v1 = vor.u32 %v3495_v58, %v3208_v59  ;;  %v2312_v25 = vld [vmem:[#allocation5 + $0xb0] sm:$0xf0]  ;;  %v2478_v56 = vld [vmem:[#allocation5 + $0x1d8] sm:$0xf] }
  0xfa   :  { %v3014_v38 = vld [vmem:[#allocation5 + $0x610] sm:$0xf]  ;;  %v2759_v48 = vor.u32 %v3387_v37, %v2758_v36  ;;  %v2856_v31 = vld [vmem:[#allocation5 + $0x4f0] sm:$0xf0]  ;;  %v3316_v57 = vld [vmem:[#allocation5 + $0x1f4] sm:$0xf0] }
  0xfb   :  { %1950 = vmatpush.bf16.msrb.mxu0 %v2279_v10  ;;  %1964 = vmatpush.bf16.msrb.mxu1 %v2535_v11  ;;  %v3451_v39 = vld [vmem:[#allocation5 + $0x62c] sm:$0xf0]  ;;  %v2379_v10 = vor.u32 %v3287_v62, %v2376_v63  ;;  %v2635_v11 = vor.u32 %v3351_v2, %v2632_v3  ;;  %v3471_v32 = vld [vmem:[#allocation5 + $0x6d4] sm:$0xf]  ;;  %v2734_v58 = vld [vmem:[#allocation5 + $0x3d8] sm:$0xf]  ;;  %v2479_v2 = vor.u32 %v3316_v57, %v2478_v56 }
  0xfc   :  { %v3015_v49 = vor.u32 %v3451_v39, %v3014_v38  ;;  %v3263_v36 = vld [vmem:[#allocation5 + $0x54] sm:$0xf]  ;;  %v2859_v38 = vor.u32 %v3407_v30, %v2856_v31  ;;  %v3380_v59 = vld [vmem:[#allocation5 + $0x3f4] sm:$0xf0] }
  0xfd   :  { %1977 = vmatpush.bf16.msrb.mxu2 %v2823_v15  ;;  %1991 = vmatpush.bf16.msrb.mxu3 %v3079_v16  ;;  %v3179_v15 = vor.u32 %v3487_v6, %v3176_v9  ;;  %v3343_v16 = vld [vmem:[#allocation5 + $0x2d4] sm:$0xf]  ;;  %v2735_v3 = vor.u32 %v3380_v59, %v2734_v58  ;;  %v2702_v6 = vld [vmem:[#allocation5 + $0x398] sm:$0xf] }
  0xfe   :  { %v2603_v23 = vor.u32 %v3343_v16, %v2600_v17  ;;  %v2280_v37 = vld [vmem:[#allocation5 + $0x70] sm:$0xf0]  ;;  %v2990_v16 = vld [vmem:[#allocation5 + $0x5d8] sm:$0xf] }
  0xff   :  { %1951 = vmatpush.bf16.msrb.mxu0 %v2247_v26  ;;  %1965 = vmatpush.bf16.msrb.mxu1 %v2503_v27  ;;  %v2891_v26 = vor.u32 %v3415_v18, %v2888_v19  ;;  %v3147_v27 = vor.u32 %v3479_v20, %v3144_v21  ;;  %v3327_v40 = vld [vmem:[#allocation5 + $0x254] sm:$0xf]  ;;  %v3444_v17 = vld [vmem:[#allocation5 + $0x5f4] sm:$0xf0]  ;;  %v2447_v20 = vor.u32 %v3308_v5, %v2446_v4 }
 0x100   :  { %v2536_v41 = vld [vmem:[#allocation5 + $0x270] sm:$0xf0]  ;;  %v3246_v18 = vld [vmem:[#allocation5 + $0x7d8] sm:$0xf] }
 0x101   :  { %1978 = vmatpush.bf16.msrb.mxu2 %v2791_v33  ;;  %1992 = vmatpush.bf16.msrb.mxu3 %v3047_v34  ;;  %v3112_v33 = vld [vmem:[#allocation5 + $0x6f0] sm:$0xf0]  ;;  %v2315_v34 = vor.u32 %v3271_v24, %v2312_v25  ;;  %v3508_v19 = vld [vmem:[#allocation5 + $0x7f4] sm:$0xf0] }
 0x102   :  { %1952 = vmatmul.bf16.vlgmr.msrb.gmra.mxu0 %v3650_v42  ;;  %1966 = vmatmul.bf16.vlgmr.msrb.gmra.mxu1 %v3652_v43  ;;  %v3115_v39 = vor.u32 %v3471_v32, %v3112_v33  ;;  %v3399_v44 = vld [vmem:[#allocation5 + $0x494] sm:$0xf]  ;;  %v2414_v24 = vld [vmem:[#allocation5 + $0x158] sm:$0xf] }
 0x103   :  { %2000 = vmatpush.bf16.msra.mxu0 %v2475_v28  ;;  %2014 = vmatpush.bf16.msra.mxu1 %v2731_v29  ;;  %v3335_v28 = vld [vmem:[#allocation5 + $0x294] sm:$0xf]  ;;  %v3300_v25 = vld [vmem:[#allocation5 + $0x174] sm:$0xf0] }
 0x104   :  { %v2568_v29 = vld [vmem:[#allocation5 + $0x2b0] sm:$0xf0]  ;;  %v2958_v30 = vld [vmem:[#allocation5 + $0x598] sm:$0xf] }
 0x105   :  { %1979 = vmatpush.bf16.msrb.mxu2 %v2759_v48  ;;  %1993 = vmatpush.bf16.msrb.mxu3 %v3015_v49  ;;  %v2571_v35 = vor.u32 %v3335_v28, %v2568_v29  ;;  %v2824_v45 = vld [vmem:[#allocation5 + $0x4b0] sm:$0xf0]  ;;  %v2283_v48 = vor.u32 %v3263_v36, %v2280_v37  ;;  %v2539_v49 = vor.u32 %v3327_v40, %v2536_v41  ;;  %v2670_v28 = vld [vmem:[#allocation5 + $0x358] sm:$0xf] }
 0x106   :  { %v3255_v50 = vld [vmem:[#allocation5 + $0x14] sm:$0xf]  ;;  %v3364_v29 = vld [vmem:[#allocation5 + $0x374] sm:$0xf0] }
 0x107   :  { %2001 = vmatpush.bf16.msra.mxu0 %v2443_v46  ;;  %2015 = vmatpush.bf16.msra.mxu1 %v2699_v47  ;;  %v3463_v46 = vld [vmem:[#allocation5 + $0x694] sm:$0xf]  ;;  %v3436_v31 = vld [vmem:[#allocation5 + $0x5b4] sm:$0xf0] }
 0x108   :  { %1980 = vmatmul.bf16.vlgmr.msrb.gmra.mxu2 %v3656_v7  ;;  %1994 = vmatmul.bf16.vlgmr.msrb.gmra.mxu3 %v3658_v8  ;;  %v3080_v47 = vld [vmem:[#allocation5 + $0x6b0] sm:$0xf0]  ;;  %v3214_v32 = vld [vmem:[#allocation5 + $0x798] sm:$0xf] }
 0x109   :  { %2028 = vmatpush.bf16.msra.mxu2 %v2987_v52  ;;  %2042 = vmatpush.bf16.msra.mxu3 %v3243_v53  ;;  %v2248_v51 = vld [vmem:[#allocation5 + $0x30] sm:$0xf0]  ;;  %v2827_v53 = vor.u32 %v3399_v44, %v2824_v45  ;;  %v3083_v54 = vor.u32 %v3463_v46, %v3080_v47  ;;  %v3500_v33 = vld [vmem:[#allocation5 + $0x7b4] sm:$0xf0] }
 0x10a   :  { %v3319_v52 = vld [vmem:[#allocation5 + $0x214] sm:$0xf]  ;;  %v2382_v37 = vld [vmem:[#allocation5 + $0x118] sm:$0xf]  ;;  %v3215_v40 = vor.u32 %v3500_v33, %v3214_v32 }
 0x10b   :  { %2002 = vmatpush.bf16.msra.mxu0 %v2411_v60  ;;  %2016 = vmatpush.bf16.msra.mxu1 %v2667_v61  ;;  %v2504_v55 = vld [vmem:[#allocation5 + $0x230] sm:$0xf0]  ;;  %v2638_v41 = vld [vmem:[#allocation5 + $0x318] sm:$0xf] }
 0x10c   :  { %v3391_v60 = vld [vmem:[#allocation5 + $0x454] sm:$0xf]  ;;  %v3356_v44 = vld [vmem:[#allocation5 + $0x334] sm:$0xf0] }
 0x10d   :  { %2029 = vmatpush.bf16.msra.mxu2 %v2955_v0  ;;  %2043 = vmatpush.bf16.msra.mxu3 %v3211_v1  ;;  %v2792_v61 = vld [vmem:[#allocation5 + $0x470] sm:$0xf0]  ;;  %v2251_v0 = vor.u32 %v3255_v50, %v2248_v51  ;;  %v2507_v1 = vor.u32 %v3319_v52, %v2504_v55  ;;  %v2926_v45 = vld [vmem:[#allocation5 + $0x558] sm:$0xf]  ;;  %v2639_v50 = vor.u32 %v3356_v44, %v2638_v41  ;;  %v3376_v44 = vld [vmem:[#allocation5 + $0x3dc] sm:$0xf] }
 0x10e   :  { %v3455_v62 = vld [vmem:[#allocation5 + $0x654] sm:$0xf]  ;;  %v2795_v9 = vor.u32 %v3391_v60, %v2792_v61  ;;  %v3428_v46 = vld [vmem:[#allocation5 + $0x574] sm:$0xf0] }
 0x10f   :  { %2003 = vmatpush.bf16.msra.mxu0 %v2379_v10  ;;  %2017 = vmatpush.bf16.msra.mxu1 %v2635_v11  ;;  %v3048_v63 = vld [vmem:[#allocation5 + $0x670] sm:$0xf0]  ;;  %v3372_v11 = vld [vmem:[#allocation5 + $0x3b4] sm:$0xf0] }
 0x110   :  { %v3051_v10 = vor.u32 %v3455_v62, %v3048_v63  ;;  %v3383_v12 = vld [vmem:[#allocation5 + $0x414] sm:$0xf]  ;;  %v2703_v21 = vor.u32 %v3372_v11, %v2702_v6  ;;  %v3182_v47 = vld [vmem:[#allocation5 + $0x758] sm:$0xf] }
 0x111   :  { %2030 = vmatpush.bf16.msra.mxu2 %v2923_v14  ;;  %2044 = vmatpush.bf16.msra.mxu3 %v3179_v15  ;;  %v2760_v13 = vld [vmem:[#allocation5 + $0x430] sm:$0xf0]  ;;  %v2350_v51 = vld [vmem:[#allocation5 + $0xd8] sm:$0xf] }
 0x112   :  { %v3447_v14 = vld [vmem:[#allocation5 + $0x614] sm:$0xf]  ;;  %v3284_v52 = vld [vmem:[#allocation5 + $0xf4] sm:$0xf0] }
 0x113   :  { %2004 = vmatpush.bf16.msra.mxu0 %v2347_v22  ;;  %2018 = vmatpush.bf16.msra.mxu1 %v2603_v23  ;;  %v3016_v15 = vld [vmem:[#allocation5 + $0x630] sm:$0xf0]  ;;  %v2763_v22 = vor.u32 %v3383_v12, %v2760_v13  ;;  %v2606_v56 = vld [vmem:[#allocation5 + $0x2d8] sm:$0xf]  ;;  %v2351_v62 = vor.u32 %v3284_v52, %v2350_v51  ;;  %v3691_v13 = vld [vmem:[%s3745_s4] sm:$0xff]  ;;  %s3596_s4 = smov [#allocation7]  }
 0x114   :  { %v3019_v23 = vor.u32 %v3447_v14, %v3016_v15  ;;  %v3348_v57 = vld [vmem:[#allocation5 + $0x2f4] sm:$0xf0]  ;;  %v425_v51 = vperm.slane %v3691_v13, 1  ;;  %s2204_s7 = sshll.u32 %s3596_s4, 4  ;;  %s2205_s7 = int_to_ptr.vmem [resolvable:$true] %s2204_s7 }
 0x115   :  { %2031 = vmatpush.bf16.msra.mxu2 %v2891_v26  ;;  %2045 = vmatpush.bf16.msra.mxu3 %v3147_v27  ;;  %v2991_v26 = vor.u32 %v3444_v17, %v2990_v16  ;;  %v3247_v27 = vor.u32 %v3508_v19, %v3246_v18  ;;  %v2894_v58 = vld [vmem:[#allocation5 + $0x518] sm:$0xf]  ;;  %v2607_v63 = vor.u32 %v3348_v57, %v2606_v56 }
 0x116   :  { %v3420_v59 = vld [vmem:[#allocation5 + $0x534] sm:$0xf0] }
 0x117   :  { %2005 = vmatpush.bf16.msra.mxu0 %v2315_v34  ;;  %2019 = vmatpush.bf16.msra.mxu1 %v2571_v35  ;;  %v2415_v34 = vor.u32 %v3300_v25, %v2414_v24  ;;  %v2671_v35 = vor.u32 %v3364_v29, %v2670_v28  ;;  %v3150_v60 = vld [vmem:[#allocation5 + $0x718] sm:$0xf]  ;;  %v424_v28 = vperm.slane %v3691_v13, 0 }
 0x118   :  { %v3484_v61 = vld [vmem:[#allocation5 + $0x734] sm:$0xf0] }
 0x119   :  { %2032 = vmatpush.bf16.msra.mxu2 %v2859_v38  ;;  %2046 = vmatpush.bf16.msra.mxu3 %v3115_v39  ;;  %v3292_v38 = vld [vmem:[#allocation5 + $0x134] sm:$0xf0]  ;;  %v2959_v39 = vor.u32 %v3436_v31, %v2958_v30  ;;  %v3151_v4 = vor.u32 %v3484_v61, %v3150_v60  ;;  %v2448_v60 = vld [vmem:[#allocation5 + $0x1b8] sm:$0xf0] }
 0x11a   :  { %v2574_v5 = vld [vmem:[#allocation5 + $0x298] sm:$0xf]  ;;  %v3368_v61 = vld [vmem:[#allocation5 + $0x39c] sm:$0xf] }
 0x11b   :  { %2006 = vmatpush.bf16.msra.mxu0 %v2283_v48  ;;  %2020 = vmatpush.bf16.msra.mxu1 %v2539_v49  ;;  %v3492_v48 = vld [vmem:[#allocation5 + $0x774] sm:$0xf0]  ;;  %v2383_v49 = vor.u32 %v3292_v38, %v2382_v37 }
 0x11c   :  { %v3183_v55 = vor.u32 %v3492_v48, %v3182_v47  ;;  %v3340_v6 = vld [vmem:[#allocation5 + $0x2b4] sm:$0xf0] }
 0x11d   :  { %2033 = vmatpush.bf16.msra.mxu2 %v2827_v53  ;;  %2047 = vmatpush.bf16.msra.mxu3 %v3083_v54  ;;  %v2927_v54 = vor.u32 %v3428_v46, %v2926_v45  ;;  %v3118_v11 = vld [vmem:[#allocation5 + $0x6d8] sm:$0xf]  ;;  %v2575_v15 = vor.u32 %v3340_v6, %v2574_v5  ;;  %v2736_v45 = vld [vmem:[#allocation5 + $0x3f8] sm:$0xf0] }
 0x11e   :  { %v3680_v36 = vpop.f32.mrf.mxu0  ;;  %v3684_v53 = vpop.f32.mrf.mxu1  ;;  %v3476_v12 = vld [vmem:[#allocation5 + $0x6f4] sm:$0xf0]  ;;  %v3440_v5 = vld [vmem:[#allocation5 + $0x5dc] sm:$0xf] }
 0x11f   :  { %2007 = vmatpush.bf16.msra.mxu0 %v2251_v0  ;;  %2021 = vmatpush.bf16.msra.mxu1 %v2507_v1  ;;  %v2318_v1 = vld [vmem:[#allocation5 + $0x98] sm:$0xf] }
 0x120   :  { %v2286_v16 = vld [vmem:[#allocation5 + $0x58] sm:$0xf] }
 0x121   :  { %2034 = vmatpush.bf16.msra.mxu2 %v2795_v9  ;;  %2048 = vmatpush.bf16.msra.mxu3 %v3051_v10  ;;  %v2862_v9 = vld [vmem:[#allocation5 + $0x4d8] sm:$0xf] }
 0x122   :  { %2008 = vmatmul.bf16.vlgmr.msra.gmra.mxu0 %v3650_v42  ;;  %2022 = vmatmul.bf16.vlgmr.msra.gmra.mxu1 %v3652_v43  ;;  %v3412_v10 = vld [vmem:[#allocation5 + $0x4f4] sm:$0xf0] }
 0x123   :  { %2056 = vmatpush.bf16.msrb.mxu0 %v2479_v2  ;;  %2070 = vmatpush.bf16.msrb.mxu1 %v2735_v3  ;;  %v3276_v2 = vld [vmem:[#allocation5 + $0xb4] sm:$0xf0]  ;;  %v2895_v3 = vor.u32 %v3420_v59, %v2894_v58  ;;  %v2739_v58 = vor.u32 %v3376_v44, %v2736_v45  ;;  %v3304_v59 = vld [vmem:[#allocation5 + $0x19c] sm:$0xf] }
 0x124   :  { %v2319_v14 = vor.u32 %v3276_v2, %v2318_v1  ;;  %v3268_v17 = vld [vmem:[#allocation5 + $0x74] sm:$0xf0]  ;;  %v3288_v44 = vld [vmem:[#allocation5 + $0x11c] sm:$0xf] }
 0x125   :  { %2035 = vmatpush.bf16.msra.mxu2 %v2763_v22  ;;  %2049 = vmatpush.bf16.msra.mxu3 %v3019_v23  ;;  %v2542_v22 = vld [vmem:[#allocation5 + $0x258] sm:$0xf]  ;;  %v2287_v30 = vor.u32 %v3268_v17, %v2286_v16  ;;  %v2384_v45 = vld [vmem:[#allocation5 + $0x138] sm:$0xf0] }
 0x126   :  { %v3686_v0 = vpop.f32.mrf.mxu0  ;;  %v3332_v23 = vld [vmem:[#allocation5 + $0x274] sm:$0xf0]  ;;  %v3698_v29 = vpop.f32.mrf.mxu1 }
 0x127   :  { %2057 = vmatpush.bf16.msrb.mxu0 %v2447_v20  ;;  %2071 = vmatpush.bf16.msrb.mxu1 %v2703_v21  ;;  %v2863_v20 = vor.u32 %v3412_v10, %v2862_v9  ;;  %v3119_v21 = vor.u32 %v3476_v12, %v3118_v11  ;;  %v2830_v24 = vld [vmem:[#allocation5 + $0x498] sm:$0xf]  ;;  %v2543_v31 = vor.u32 %v3332_v23, %v2542_v22  ;;  %v2992_v10 = vld [vmem:[#allocation5 + $0x5f8] sm:$0xf0] }
 0x128   :  { %2036 = vmatmul.bf16.vlgmr.msra.gmra.mxu2 %v3656_v7  ;;  %2050 = vmatmul.bf16.vlgmr.msra.gmra.mxu3 %v3658_v8  ;;  %v3404_v25 = vld [vmem:[#allocation5 + $0x4b4] sm:$0xf0]  ;;  %v3504_v11 = vld [vmem:[#allocation5 + $0x7dc] sm:$0xf]  ;;  %v2995_v23 = vor.u32 %v3440_v5, %v2992_v10 }
 0x129   :  { %2084 = vmatpush.bf16.msrb.mxu2 %v2991_v26  ;;  %2098 = vmatpush.bf16.msrb.mxu3 %v3247_v27  ;;  %v3086_v26 = vld [vmem:[#allocation5 + $0x698] sm:$0xf]  ;;  %v3248_v12 = vld [vmem:[#allocation5 + $0x7f8] sm:$0xf0] }
 0x12a   :  { %v3468_v27 = vld [vmem:[#allocation5 + $0x6b4] sm:$0xf0]  ;;  %v2416_v22 = vld [vmem:[#allocation5 + $0x178] sm:$0xf0] }
 0x12b   :  { %2058 = vmatpush.bf16.msrb.mxu0 %v2415_v34  ;;  %2072 = vmatpush.bf16.msrb.mxu1 %v2671_v35  ;;  %v3693_v18 = vpop.f32.mrf.mxu2  ;;  %v3695_v19 = vpop.f32.mrf.mxu3  ;;  %v2254_v32 = vld [vmem:[#allocation5 + $0x18] sm:$0xf]  ;;  %v2831_v35 = vor.u32 %v3404_v25, %v2830_v24  ;;  %v3087_v37 = vor.u32 %v3468_v27, %v3086_v26  ;;  %v3251_v24 = vor.u32 %v3504_v11, %v3248_v12  ;;  %v3360_v25 = vld [vmem:[#allocation5 + $0x35c] sm:$0xf] }
 0x12c   :  { %v3260_v33 = vld [vmem:[#allocation5 + $0x34] sm:$0xf0]  ;;  %v2672_v26 = vld [vmem:[#allocation5 + $0x378] sm:$0xf0] }
 0x12d   :  { %2085 = vmatpush.bf16.msrb.mxu2 %v2959_v39  ;;  %2099 = vmatpush.bf16.msrb.mxu3 %v3215_v40  ;;  %v2510_v34 = vld [vmem:[#allocation5 + $0x218] sm:$0xf]  ;;  %v3312_v39 = vld [vmem:[#allocation5 + $0x1dc] sm:$0xf]  ;;  %v2255_v52 = vor.u32 %v3260_v33, %v2254_v32 }
 0x12e   :  { %v3324_v38 = vld [vmem:[#allocation5 + $0x234] sm:$0xf0]  ;;  %v2480_v40 = vld [vmem:[#allocation5 + $0x1f8] sm:$0xf0] }
 0x12f   :  { %2059 = vmatpush.bf16.msrb.mxu0 %v2383_v49  ;;  %2073 = vmatpush.bf16.msrb.mxu1 %v2639_v50  ;;  %v1785_v41 = vpop.f32.mrf.mxu0  ;;  %v2798_v46 = vld [vmem:[#allocation5 + $0x458] sm:$0xf]  ;;  %v1730_v50 = vadd.f32 %v3680_v36, %v424_v28  ;;  %v2483_v57 = vor.u32 %v3312_v39, %v2480_v40  ;;  %v2704_v36 = vld [vmem:[#allocation5 + $0x3b8] sm:$0xf0] }
 0x130   :  { %v3396_v47 = vld [vmem:[#allocation5 + $0x474] sm:$0xf0]  ;;  %v1786_v9 = vadd.f32 %v1785_v41, %v425_v51  ;;  %v2707_v16 = vor.u32 %v3368_v61, %v2704_v36  ;;  %v3432_v27 = vld [vmem:[#allocation5 + $0x59c] sm:$0xf]  ;;  %v2675_v41 = vor.u32 %v3360_v25, %v2672_v26 }
 0x131   :  { %2086 = vmatpush.bf16.msrb.mxu2 %v2927_v54  ;;  %2100 = vmatpush.bf16.msrb.mxu3 %v3183_v55  ;;  %v3054_v48 = vld [vmem:[#allocation5 + $0x658] sm:$0xf]  ;;  %v2511_v54 = vor.u32 %v3324_v38, %v2510_v34  ;;  %v1744_v6 = vadd.f32 %v3684_v53, %v1730_v50  ;;  %v3296_v53 = vld [vmem:[#allocation5 + $0x15c] sm:$0xf] }
 0x132   :  { %v3460_v49 = vld [vmem:[#allocation5 + $0x674] sm:$0xf0]  ;;  %v2960_v32 = vld [vmem:[#allocation5 + $0x5b8] sm:$0xf0]  ;;  %v2419_v38 = vor.u32 %v3296_v53, %v2416_v22 }
 0x133   :  { %2060 = vmatpush.bf16.msrb.mxu0 %v2351_v62  ;;  %2074 = vmatpush.bf16.msrb.mxu1 %v2607_v63  ;;  %v3704_v55 = vpop.f32.mrf.mxu2  ;;  %v3706_v56 = vpop.f32.mrf.mxu3  ;;  %v2799_v62 = vor.u32 %v3396_v47, %v2798_v46  ;;  %v3055_v63 = vor.u32 %v3460_v49, %v3054_v48  ;;  %v2766_v1 = vld [vmem:[#allocation5 + $0x418] sm:$0xf]  ;;  %v1758_v17 = vadd.f32 %v3693_v18, %v1744_v6  ;;  %v3496_v33 = vld [vmem:[#allocation5 + $0x79c] sm:$0xf] }
 0x134   :  { %v3388_v2 = vld [vmem:[#allocation5 + $0x434] sm:$0xf0]  ;;  %v3216_v34 = vld [vmem:[#allocation5 + $0x7b8] sm:$0xf0] }
 0x135   :  { %2087 = vmatpush.bf16.msrb.mxu2 %v2895_v3  ;;  %2101 = vmatpush.bf16.msrb.mxu3 %v3151_v4  ;;  %v3022_v3 = vld [vmem:[#allocation5 + $0x618] sm:$0xf]  ;;  %v1772_v39 = vadd.f32 %v3695_v19, %v1758_v17  ;;  %v3352_v46 = vld [vmem:[#allocation5 + $0x31c] sm:$0xf] }
 0x136   :  { %v3452_v4 = vld [vmem:[#allocation5 + $0x634] sm:$0xf0]  ;;  %v2640_v47 = vld [vmem:[#allocation5 + $0x338] sm:$0xf0] }
 0x137   :  { %2061 = vmatpush.bf16.msrb.mxu0 %v2319_v14  ;;  %2075 = vmatpush.bf16.msrb.mxu1 %v2575_v15  ;;  %v1799_v14 = vpop.f32.mrf.mxu1  ;;  %v2451_v15 = vor.u32 %v3304_v59, %v2448_v60  ;;  %v3424_v48 = vld [vmem:[#allocation5 + $0x55c] sm:$0xf]  ;;  %v2168_v59 = vmax.f32 %v1772_v39, 0.0 }
 0x138   :  { %v1800_v18 = vadd.f32 %v1799_v14, %v1786_v9  ;;  %v2928_v19 = vld [vmem:[#allocation5 + $0x578] sm:$0xf0] }
 0x139   :  { %2088 = vmatpush.bf16.msrb.mxu2 %v2863_v20  ;;  %2102 = vmatpush.bf16.msrb.mxu3 %v3119_v21  ;;  %v2767_v20 = vor.u32 %v3388_v2, %v2766_v1  ;;  %v3023_v21 = vor.u32 %v3452_v4, %v3022_v3  ;;  %v3344_v2 = vld [vmem:[#allocation5 + $0x2dc] sm:$0xf] }
 0x13a   :  { %v2608_v3 = vld [vmem:[#allocation5 + $0x2f8] sm:$0xf0] }
 0x13b   :  { %2062 = vmatpush.bf16.msrb.mxu0 %v2287_v30  ;;  %2076 = vmatpush.bf16.msrb.mxu1 %v2543_v31  ;;  %v1732_v30 = vadd.f32 %v3686_v0, %v424_v28  ;;  %v1787_v31 = vpop.f32.mrf.mxu0  ;;  %v2963_v0 = vor.u32 %v3432_v27, %v2960_v32  ;;  %v3219_v28 = vor.u32 %v3496_v33, %v3216_v34  ;;  %v3416_v4 = vld [vmem:[#allocation5 + $0x51c] sm:$0xf] }
 0x13c   :  { %v1788_v50 = vadd.f32 %v1787_v31, %v425_v51  ;;  %v2931_v51 = vor.u32 %v3424_v48, %v2928_v19  ;;  %v2896_v9 = vld [vmem:[#allocation5 + $0x538] sm:$0xf0] }
 0x13d   :  { %2089 = vmatpush.bf16.msrb.mxu2 %v2831_v35  ;;  %2103 = vmatpush.bf16.msrb.mxu3 %v3087_v37  ;;  %v1813_v35 = vpop.f32.mrf.mxu2  ;;  %v1827_v37 = vpop.f32.mrf.mxu3  ;;  %v1746_v49 = vadd.f32 %v3698_v29, %v1732_v30  ;;  %v3280_v29 = vld [vmem:[#allocation5 + $0xdc] sm:$0xf]  ;;  %v2899_v53 = vor.u32 %v3416_v4, %v2896_v9 }
 0x13e   :  { %v1814_v40 = vadd.f32 %v1813_v35, %v1800_v18  ;;  %v3480_v10 = vld [vmem:[#allocation5 + $0x71c] sm:$0xf] }
 0x13f   :  { %2063 = vmatpush.bf16.msrb.mxu0 %v2255_v52  ;;  %2077 = vmatpush.bf16.msrb.mxu1 %v2511_v54  ;;  %v3488_v54 = vld [vmem:[#allocation5 + $0x75c] sm:$0xf]  ;;  %v1760_v60 = vadd.f32 %v3704_v55, %v1746_v49  ;;  %v1801_v36 = vpop.f32.mrf.mxu1 }
 0x140   :  { %v1828_v52 = vadd.f32 %v1827_v37, %v1814_v40  ;;  %v1802_v5 = vadd.f32 %v1801_v36, %v1788_v50  ;;  %v3152_v11 = vld [vmem:[#allocation5 + $0x738] sm:$0xf0] }
 0x141   :  { %2090 = vmatpush.bf16.msrb.mxu2 %v2799_v62  ;;  %2104 = vmatpush.bf16.msrb.mxu3 %v3055_v63  ;;  %v2643_v62 = vor.u32 %v3352_v46, %v2640_v47  ;;  %v2352_v63 = vld [vmem:[#allocation5 + $0xf8] sm:$0xf0]  ;;  %v1774_v14 = vadd.f32 %v3706_v56, %v1760_v60  ;;  %v3155_v22 = vor.u32 %v3480_v10, %v3152_v11 }
 0x142   :  { %2064 = vmatmul.bf16.vlgmr.msrb.gmra.mxu0 %v3650_v42  ;;  %2078 = vmatmul.bf16.vlgmr.msrb.gmra.mxu1 %v3652_v43  ;;  %v2169_v61 = vmax.f32 %v1828_v52, 0.0  ;;  %v2355_v12 = vor.u32 %v3280_v29, %v2352_v63  ;;  %v3272_v17 = vld [vmem:[#allocation5 + $0x9c] sm:$0xf] }
 0x143   :  { %2112 = vmatpush.bf16.msra.mxu0 %v2483_v57  ;;  %2126 = vmatpush.bf16.msra.mxu1 %v2739_v58  ;;  %v3184_v57 = vld [vmem:[#allocation5 + $0x778] sm:$0xf0]  ;;  %v2387_v58 = vor.u32 %v3288_v44, %v2384_v45  ;;  %v2176_v56 = vmax.f32 %v1774_v14, 0.0  ;;  %v1841_v46 = vpop.f32.mrf.mxu0 }
 0x144   :  { %v3187_v1 = vor.u32 %v3488_v54, %v3184_v57  ;;  %v2184_v6 = vpack.c.bf16 %v2169_v61, %v2168_v59  ;;  %v3408_v25 = vld [vmem:[#allocation5 + $0x4dc] sm:$0xf] }
 0x145   :  { %2091 = vmatpush.bf16.msrb.mxu2 %v2767_v20  ;;  %2105 = vmatpush.bf16.msrb.mxu3 %v3023_v21  ;;  %v1815_v55 = vpop.f32.mrf.mxu2  ;;  %v2320_v20 = vld [vmem:[#allocation5 + $0xb8] sm:$0xf0]  ;;  %v1829_v21 = vpop.f32.mrf.mxu3 }
 0x146   :  { %2192 = vst [vmem:[#allocation7] sm:$0xff] %v2184_v6  ;;  %v2864_v27 = vld [vmem:[#allocation5 + $0x4f8] sm:$0xf0]  ;;  %v2323_v32 = vor.u32 %v3272_v17, %v2320_v20 }
 0x147   :  { %2113 = vmatpush.bf16.msra.mxu0 %v2451_v15  ;;  %2127 = vmatpush.bf16.msra.mxu1 %v2707_v16  ;;  %v1816_v15 = vadd.f32 %v1815_v55, %v1802_v5  ;;  %v2611_v16 = vor.u32 %v3344_v2, %v2608_v3  ;;  %v3472_v30 = vld [vmem:[#allocation5 + $0x6dc] sm:$0xf]  ;;  %v2867_v37 = vor.u32 %v3408_v25, %v2864_v27  ;;  %v426_v55 = vperm.slane %v3691_v13, 2 }
 0x148   :  { %2092 = vmatmul.bf16.vlgmr.msrb.gmra.mxu2 %v3656_v7  ;;  %2106 = vmatmul.bf16.vlgmr.msrb.gmra.mxu3 %v3658_v8  ;;  %v3120_v18 = vld [vmem:[#allocation5 + $0x6f8] sm:$0xf0] }
 0x149   :  { %2140 = vmatpush.bf16.msra.mxu2 %v2995_v23  ;;  %2154 = vmatpush.bf16.msra.mxu3 %v3251_v24  ;;  %v3336_v23 = vld [vmem:[#allocation5 + $0x29c] sm:$0xf]  ;;  %v1830_v26 = vadd.f32 %v1829_v21, %v1816_v15  ;;  %v1842_v15 = vadd.f32 %v1841_v46, %v426_v55 }
 0x14a   :  { %v2576_v24 = vld [vmem:[#allocation5 + $0x2b8] sm:$0xf0] }
 0x14b   :  { %2114 = vmatpush.bf16.msra.mxu0 %v2419_v38  ;;  %2128 = vmatpush.bf16.msra.mxu1 %v2675_v41  ;;  %v2177_v31 = vmax.f32 %v1830_v26, 0.0  ;;  %v2579_v33 = vor.u32 %v3336_v23, %v2576_v24  ;;  %v3264_v34 = vld [vmem:[#allocation5 + $0x5c] sm:$0xf]  ;;  %v3123_v38 = vor.u32 %v3472_v30, %v3120_v18  ;;  %v1843_v5 = vpop.f32.mrf.mxu0 }
 0x14c   :  { %v2288_v35 = vld [vmem:[#allocation5 + $0x78] sm:$0xf0] }
 0x14d   :  { %2141 = vmatpush.bf16.msra.mxu2 %v2963_v0  ;;  %2155 = vmatpush.bf16.msra.mxu3 %v3219_v28  ;;  %v3328_v39 = vld [vmem:[#allocation5 + $0x25c] sm:$0xf]  ;;  %v2188_v44 = vpack.c.bf16 %v2177_v31, %v2176_v56  ;;  %v2291_v47 = vor.u32 %v3264_v34, %v2288_v35  ;;  %v1869_v10 = vpop.f32.mrf.mxu2  ;;  %v1883_v11 = vpop.f32.mrf.mxu3 }
 0x14e   :  { %v2544_v40 = vld [vmem:[#allocation5 + $0x278] sm:$0xf0] }
 0x14f   :  { %2115 = vmatpush.bf16.msra.mxu0 %v2387_v58  ;;  %2129 = vmatpush.bf16.msra.mxu1 %v2643_v62  ;;  %v3400_v41 = vld [vmem:[#allocation5 + $0x49c] sm:$0xf]  ;;  %2196 = vst [vmem:[#allocation7 + $0x20] sm:$0xff] %v2188_v44  ;;  %v2547_v48 = vor.u32 %v3328_v39, %v2544_v40 }
 0x150   :  { %v2832_v45 = vld [vmem:[#allocation5 + $0x4b8] sm:$0xf0] }
 0x151   :  { %2142 = vmatpush.bf16.msra.mxu2 %v2931_v51  ;;  %2156 = vmatpush.bf16.msra.mxu3 %v3187_v1  ;;  %v3464_v0 = vld [vmem:[#allocation5 + $0x69c] sm:$0xf]  ;;  %v2835_v52 = vor.u32 %v3400_v41, %v2832_v45  ;;  %v1855_v1 = vpop.f32.mrf.mxu1 }
 0x152   :  { %v3088_v28 = vld [vmem:[#allocation5 + $0x6b8] sm:$0xf0]  ;;  %v1856_v21 = vadd.f32 %v1855_v1, %v1842_v15 }
 0x153   :  { %2116 = vmatpush.bf16.msra.mxu0 %v2355_v12  ;;  %2130 = vmatpush.bf16.msra.mxu1 %v2611_v16  ;;  %v3256_v49 = vld [vmem:[#allocation5 + $0x1c] sm:$0xf]  ;;  %v3091_v19 = vor.u32 %v3464_v0, %v3088_v28  ;;  %v427_v16 = vperm.slane %v3691_v13, 3 }
 0x154   :  { %v2256_v50 = vld [vmem:[#allocation5 + $0x38] sm:$0xf0] }
 0x155   :  { %2143 = vmatpush.bf16.msra.mxu2 %v2899_v53  ;;  %2157 = vmatpush.bf16.msra.mxu3 %v3155_v22  ;;  %v3320_v54 = vld [vmem:[#allocation5 + $0x21c] sm:$0xf]  ;;  %v2259_v62 = vor.u32 %v3256_v49, %v2256_v50  ;;  %v1871_v17 = vpop.f32.mrf.mxu2  ;;  %v1885_v20 = vpop.f32.mrf.mxu3  ;;  %v1870_v22 = vadd.f32 %v1869_v10, %v1856_v21  ;;  %v428_v50 = vperm.slane %v3691_v13, 4 }
 0x156   :  { %v2512_v57 = vld [vmem:[#allocation5 + $0x238] sm:$0xf0] }
 0x157   :  { %2117 = vmatpush.bf16.msra.mxu0 %v2323_v32  ;;  %2131 = vmatpush.bf16.msra.mxu1 %v2579_v33  ;;  %v3392_v58 = vld [vmem:[#allocation5 + $0x45c] sm:$0xf]  ;;  %v2515_v29 = vor.u32 %v3320_v54, %v2512_v57  ;;  %v1884_v27 = vadd.f32 %v1883_v11, %v1870_v22  ;;  %v429_v57 = vperm.slane %v3691_v13, 5 }
 0x158   :  { %v2800_v59 = vld [vmem:[#allocation5 + $0x478] sm:$0xf0] }
 0x159   :  { %2144 = vmatpush.bf16.msra.mxu2 %v2867_v37  ;;  %2158 = vmatpush.bf16.msra.mxu3 %v3123_v38  ;;  %v3456_v60 = vld [vmem:[#allocation5 + $0x65c] sm:$0xf]  ;;  %v2803_v63 = vor.u32 %v3392_v58, %v2800_v59  ;;  %v1857_v12 = vpop.f32.mrf.mxu1  ;;  %v2170_v56 = vmax.f32 %v1884_v27, 0.0 }
 0x15a   :  { %v3056_v61 = vld [vmem:[#allocation5 + $0x678] sm:$0xf0] }
 0x15b   :  { %2118 = vmatpush.bf16.msra.mxu0 %v2291_v47  ;;  %2132 = vmatpush.bf16.msra.mxu1 %v2547_v48  ;;  %v3059_v36 = vor.u32 %v3456_v60, %v3056_v61  ;;  %v3384_v51 = vld [vmem:[#allocation5 + $0x41c] sm:$0xf] }
 0x15c   :  { %v2768_v2 = vld [vmem:[#allocation5 + $0x438] sm:$0xf0] }
 0x15d   :  { %2145 = vmatpush.bf16.msra.mxu2 %v2835_v52  ;;  %2159 = vmatpush.bf16.msra.mxu3 %v3091_v19  ;;  %v3448_v3 = vld [vmem:[#allocation5 + $0x61c] sm:$0xf]  ;;  %v2771_v6 = vor.u32 %v3384_v51, %v2768_v2 }
 0x15e   :  { %v3024_v4 = vld [vmem:[#allocation5 + $0x638] sm:$0xf0] }
 0x15f   :  { %2119 = vmatpush.bf16.msra.mxu0 %v2259_v62  ;;  %2133 = vmatpush.bf16.msra.mxu1 %v2515_v29  ;;  %v3027_v9 = vor.u32 %v3448_v3, %v3024_v4  ;;  %v1897_v14 = vpop.f32.mrf.mxu0 }
 0x160   :  { %v1898_v53 = vadd.f32 %v1897_v14, %v427_v16 }
 0x161   :  { %2146 = vmatpush.bf16.msra.mxu2 %v2803_v63  ;;  %2160 = vmatpush.bf16.msra.mxu3 %v3059_v36 }
 0x162   :  { %2120 = vmatmul.bf16.vlgmr.msra.gmra.mxu0 %v3650_v42  ;;  %2134 = vmatmul.bf16.vlgmr.msra.gmra.mxu1 %v3652_v43  ;;  %v1911_v42 = vpop.f32.mrf.mxu1  ;;  %v1844_v43 = vadd.f32 %v1843_v5, %v426_v55 }
 0x163   :  { %v1912_v23 = vadd.f32 %v1911_v42, %v1898_v53 }
 0x165   :  { %2147 = vmatpush.bf16.msra.mxu2 %v2771_v6  ;;  %2161 = vmatpush.bf16.msra.mxu3 %v3027_v9 }
 0x167   :  { %v1899_v24 = vpop.f32.mrf.mxu0 }
 0x168   :  { %2148 = vmatmul.bf16.vlgmr.msra.gmra.mxu2 %v3656_v7  ;;  %2162 = vmatmul.bf16.vlgmr.msra.gmra.mxu3 %v3658_v8  ;;  %v1858_v7 = vadd.f32 %v1857_v12, %v1844_v43  ;;  %v1900_v18 = vadd.f32 %v1899_v24, %v427_v16 }
 0x16a   :  { %v1872_v31 = vadd.f32 %v1871_v17, %v1858_v7  ;;  %v1913_v33 = vpop.f32.mrf.mxu1 }
 0x16b   :  { %v1925_v25 = vpop.f32.mrf.mxu2  ;;  %v1939_v26 = vpop.f32.mrf.mxu3  ;;  %v1914_v34 = vadd.f32 %v1913_v33, %v1900_v18 }
 0x16c   :  { %v1926_v30 = vadd.f32 %v1925_v25, %v1912_v23  ;;  %v1886_v38 = vadd.f32 %v1885_v20, %v1872_v31 }
 0x16e   :  { %v1940_v8 = vadd.f32 %v1939_v26, %v1926_v30  ;;  %v2178_v44 = vmax.f32 %v1886_v38, 0.0  ;;  %v430_v30 = vperm.slane %v3691_v13, 6 }
 0x170   :  { %v2171_v32 = vmax.f32 %v1940_v8, 0.0 }
 0x172   :  { %v2185_v35 = vpack.c.bf16 %v2171_v32, %v2170_v56  ;;  %v431_v56 = vperm.slane %v3691_v13, 7 }
 0x173   :  { %v1927_v37 = vpop.f32.mrf.mxu2  ;;  %v1941_v40 = vpop.f32.mrf.mxu3 }
 0x174   :  { %2193 = vst [vmem:[#allocation7 + $0x8] sm:$0xff] %v2185_v35  ;;  %v1928_v39 = vadd.f32 %v1927_v37, %v1914_v34 }
 0x176   :  { %v1942_v41 = vadd.f32 %v1941_v40, %v1928_v39 }
 0x178   :  { %v2179_v45 = vmax.f32 %v1942_v41, 0.0 }
 0x17a   :  { %v2189_v0 = vpack.c.bf16 %v2179_v45, %v2178_v44 }
 0x17c   :  { %2197 = vst [vmem:[#allocation7 + $0x28] sm:$0xff] %v2189_v0 }
 0x17f   :  { %v1953_v28 = vpop.f32.mrf.mxu0  ;;  %v1967_v46 = vpop.f32.mrf.mxu1 }
 0x180   :  { %v1954_v54 = vadd.f32 %v1953_v28, %v428_v50 }
 0x182   :  { %v1968_v60 = vadd.f32 %v1967_v46, %v1954_v54 }
 0x187   :  { %v1955_v47 = vpop.f32.mrf.mxu0  ;;  %v1969_v52 = vpop.f32.mrf.mxu1 }
 0x188   :  { %v1956_v63 = vadd.f32 %v1955_v47, %v428_v50 }
 0x18a   :  { %v1970_v5 = vadd.f32 %v1969_v52, %v1956_v63 }
 0x18b   :  { %v1981_v48 = vpop.f32.mrf.mxu2  ;;  %v1995_v49 = vpop.f32.mrf.mxu3 }
 0x18c   :  { %v1982_v29 = vadd.f32 %v1981_v48, %v1968_v60 }
 0x18e   :  { %v1996_v3 = vadd.f32 %v1995_v49, %v1982_v29 }
 0x190   :  { %v2172_v10 = vmax.f32 %v1996_v3, 0.0 }
 0x193   :  { %v1983_v58 = vpop.f32.mrf.mxu2  ;;  %v1997_v59 = vpop.f32.mrf.mxu3 }
 0x194   :  { %v1984_v11 = vadd.f32 %v1983_v58, %v1970_v5 }
 0x196   :  { %v1998_v17 = vadd.f32 %v1997_v59, %v1984_v11 }
 0x198   :  { %v2180_v42 = vmax.f32 %v1998_v17, 0.0 }
 0x19f   :  { %v2009_v19 = vpop.f32.mrf.mxu0  ;;  %v2023_v62 = vpop.f32.mrf.mxu1 }
 0x1a0   :  { %v2010_v61 = vadd.f32 %v2009_v19, %v429_v57 }
 0x1a2   :  { %v2024_v36 = vadd.f32 %v2023_v62, %v2010_v61 }
 0x1a7   :  { %v2011_v51 = vpop.f32.mrf.mxu0  ;;  %v2025_v12 = vpop.f32.mrf.mxu1 }
 0x1a8   :  { %v2012_v6 = vadd.f32 %v2011_v51, %v429_v57 }
 0x1aa   :  { %v2026_v14 = vadd.f32 %v2025_v12, %v2012_v6 }
 0x1ab   :  { %v2037_v1 = vpop.f32.mrf.mxu2  ;;  %v2051_v2 = vpop.f32.mrf.mxu3 }
 0x1ac   :  { %v2038_v4 = vadd.f32 %v2037_v1, %v2024_v36 }
 0x1ae   :  { %v2052_v9 = vadd.f32 %v2051_v2, %v2038_v4 }
 0x1b0   :  { %v2173_v55 = vmax.f32 %v2052_v9, 0.0 }
 0x1b2   :  { %v2186_v15 = vpack.c.bf16 %v2173_v55, %v2172_v10 }
 0x1b3   :  { %v2039_v16 = vpop.f32.mrf.mxu2  ;;  %v2053_v21 = vpop.f32.mrf.mxu3 }
 0x1b4   :  { %2194 = vst [vmem:[#allocation7 + $0x10] sm:$0xff] %v2186_v15  ;;  %v2040_v20 = vadd.f32 %v2039_v16, %v2026_v14 }
 0x1b6   :  { %v2054_v53 = vadd.f32 %v2053_v21, %v2040_v20 }
 0x1b8   :  { %v2181_v22 = vmax.f32 %v2054_v53, 0.0 }
 0x1ba   :  { %v2190_v43 = vpack.c.bf16 %v2181_v22, %v2180_v42 }
 0x1bc   :  { %2198 = vst [vmem:[#allocation7 + $0x30] sm:$0xff] %v2190_v43 }
 0x1bf   :  { %v2065_v23 = vpop.f32.mrf.mxu0  ;;  %v2079_v24 = vpop.f32.mrf.mxu1 }
 0x1c0   :  { %v2066_v8 = vadd.f32 %v2065_v23, %v430_v30 }
 0x1c2   :  { %v2080_v33 = vadd.f32 %v2079_v24, %v2066_v8 }
 0x1c7   :  { %v2067_v25 = vpop.f32.mrf.mxu0  ;;  %v2081_v7 = vpop.f32.mrf.mxu1 }
 0x1c8   :  { %v2068_v38 = vadd.f32 %v2067_v25, %v430_v30 }
 0x1ca   :  { %v2082_v28 = vadd.f32 %v2081_v7, %v2068_v38 }
 0x1cb   :  { %v2093_v26 = vpop.f32.mrf.mxu2  ;;  %v2107_v27 = vpop.f32.mrf.mxu3 }
 0x1cc   :  { %v2094_v37 = vadd.f32 %v2093_v26, %v2080_v33 }
 0x1ce   :  { %v2108_v45 = vadd.f32 %v2107_v27, %v2094_v37 }
 0x1d0   :  { %v2174_v48 = vmax.f32 %v2108_v45, 0.0 }
 0x1d3   :  { %v2095_v31 = vpop.f32.mrf.mxu2  ;;  %v2109_v32 = vpop.f32.mrf.mxu3 }
 0x1d4   :  { %v2096_v49 = vadd.f32 %v2095_v31, %v2082_v28 }
 0x1d6   :  { %v2110_v57 = vadd.f32 %v2109_v32, %v2096_v49 }
 0x1d8   :  { %v2182_v61 = vmax.f32 %v2110_v57, 0.0 }
 0x1df   :  { %v2121_v18 = vpop.f32.mrf.mxu0  ;;  %v2135_v35 = vpop.f32.mrf.mxu1 }
 0x1e0   :  { %v2122_v34 = vadd.f32 %v2121_v18, %v431_v56 }
 0x1e2   :  { %v2136_v39 = vadd.f32 %v2135_v35, %v2122_v34 }
 0x1e7   :  { %v2123_v40 = vpop.f32.mrf.mxu0  ;;  %v2137_v13 = vpop.f32.mrf.mxu1 }
 0x1e8   :  { %v2124_v46 = vadd.f32 %v2123_v40, %v431_v56 }
 0x1ea   :  { %v2138_v52 = vadd.f32 %v2137_v13, %v2124_v46 }
 0x1eb   :  { %v2149_v41 = vpop.f32.mrf.mxu2  ;;  %v2163_v44 = vpop.f32.mrf.mxu3 }
 0x1ec   :  { %v2150_v0 = vadd.f32 %v2149_v41, %v2136_v39 }
 0x1ee   :  { %v2164_v47 = vadd.f32 %v2163_v44, %v2150_v0 }
 0x1f0   :  { %v2175_v50 = vmax.f32 %v2164_v47, 0.0 }
 0x1f2   :  { %v2187_v19 = vpack.c.bf16 %v2175_v50, %v2174_v48 }
 0x1f3   :  { %v2151_v54 = vpop.f32.mrf.mxu2  ;;  %v2165_v59 = vpop.f32.mrf.mxu3 }
 0x1f4   :  { %2195 = vst [vmem:[#allocation7 + $0x18] sm:$0xff] %v2187_v19  ;;  %v2152_v58 = vadd.f32 %v2151_v54, %v2138_v52 }
 0x1f6   :  { %v2166_v60 = vadd.f32 %v2165_v59, %v2152_v58 }
 0x1f8   :  { %v2183_v62 = vmax.f32 %v2166_v60, 0.0 }
 0x1fa   :  { %v2191_v29 = vpack.c.bf16 %v2183_v62, %v2182_v61 }
 0x1fc   :  { %2199 = vst [vmem:[#allocation7 + $0x38] sm:$0xff] %v2191_v29 }
 0x1fd   :  { %2212 = dma.vmem_to_hbm [thread:$0]  %s2205_s7, 1024, %s2207_s10, [#allocation4], %s3594_s28, %s3594_s28, %s3595_s29  }
 0x1fe   :  { %3590 = dma.done.wait [#allocation4], 1024  }
 0x1ff   :  { %3591 = vsyncadd [#allocation4], 4294966272 }
 0x200   :  { %2217 = vsyncpa [#allocation3], 1 }
 0x201   :  { %2218 = vsyncpa [#allocation6], 1 }
 0x202   :  { %2219 = vsyncpa [#allocation4], 1 }

</bundles_post_ra>
